<compile_context>
chip_gen: v7x
topology: tpu7x:2x2x1
jax: 0.10.0
libtpu: 0.0.40
codegen_flags: <defaults>
</compile_context>

<pallas_src>
import functools

import jax
import jax.numpy as jnp
from jax.experimental import pallas as pl
from jax.experimental.pallas import tpu as pltpu

LANE = 128


def _round_up(x, m):
    return (x + m - 1) // m * m


def _conv_batch_tiling(batch):
    """Images per grid step (bt) and padded batch.  >=2 grid steps when
    possible (v7x megacore); unroll capped at 8 images per step."""
    if batch >= 16:
        bt = 8
    else:
        bt = max(1, batch // 2)
    return bt, _round_up(batch, bt)


def _fc_m_tiling(m):
    """Padded M and M tile for the fused FC kernel: tile up to 512, tm a
    multiple of 16 (bf16 sublane tile), >=2 grid steps."""
    if m > 1024:
        tm = 512
        mp = _round_up(m, tm)
    else:
        mp = _round_up(max(m, 32), 32)
        tm = mp // 2
    return mp, tm


# ----------------------------------------------------------------------------
# Conv (+bias+ReLU) as banded matmuls, fused im2col, compact output
# ----------------------------------------------------------------------------
def _conv_band_kernel(x_ref, w_ref, b_ref, o_ref, *, k, out_h, bt):
    # x_ref: (bt, H, W*C) bf16, w_ref: (k, W*C, Wo*Cout) bf16,
    # b_ref: (1, Wo*Cout) f32, o_ref: (bt, Ho, Wo*Cout) bf16.
    for b in range(bt):                       # unrolled (bt <= 8)
        acc = jnp.dot(x_ref[b, 0:out_h, :], w_ref[0],
                      preferred_element_type=jnp.float32)
        for di in range(1, k):                # k accumulated MXU matmuls
            acc += jnp.dot(x_ref[b, di:di + out_h, :], w_ref[di],
                           preferred_element_type=jnp.float32)
        acc = jnp.maximum(acc + b_ref[...], 0.0)          # f32 epilogue
        o_ref[b] = acc.astype(o_ref.dtype)


def conv_band_pallas(x_rows, w_band, b_band, *, bt):
    """Valid conv (stride 1) + bias + ReLU.
    x_rows: (Bp, H, W*C) bf16 (channels-last rows), w_band: (k, W*C, Wo*Cout),
    b_band: (1, Wo*Cout).  Returns compact (Bp, Ho, Wo*Cout) bf16."""
    bp, h, wc = x_rows.shape
    k, wc2, n = w_band.shape
    assert wc2 == wc and b_band.shape == (1, n) and bp % bt == 0
    out_h = h - k + 1
    kernel = functools.partial(_conv_band_kernel, k=k, out_h=out_h, bt=bt)
    return pl.pallas_call(
        kernel,
        out_shape=jax.ShapeDtypeStruct((bp, out_h, n), jnp.bfloat16),
        grid=(bp // bt,),
        in_specs=[
            pl.BlockSpec((bt, h, wc), lambda i: (i, 0, 0)),   # pipelined images
            pl.BlockSpec((k, wc, n), lambda i: (0, 0, 0)),    # resident band weights
            pl.BlockSpec((1, n), lambda i: (0, 0)),           # resident bias band
        ],
        out_specs=pl.BlockSpec((bt, out_h, n), lambda i: (i, 0, 0)),
        compiler_params=pltpu.CompilerParams(
            dimension_semantics=("parallel",)),
    )(x_rows, w_band, b_band)


# ----------------------------------------------------------------------------
# Fused FC tail: fc1 -> relu -> fc2 -> relu -> fc3
# ----------------------------------------------------------------------------
def _fc_fused_kernel(x_ref, w1_ref, b1_ref, w2_ref, b2_ref, w3_ref, b3_ref,
                     o_ref):
    h = jnp.dot(x_ref[...], w1_ref[...], preferred_element_type=jnp.float32)
    h = jnp.maximum(h + b1_ref[...], 0.0).astype(jnp.bfloat16)
    h = jnp.dot(h, w2_ref[...], preferred_element_type=jnp.float32)
    h = jnp.maximum(h + b2_ref[...], 0.0).astype(jnp.bfloat16)
    out = jnp.dot(h, w3_ref[...], preferred_element_type=jnp.float32)
    o_ref[...] = (out + b3_ref[...]).astype(o_ref.dtype)


def fc_fused_pallas(x, w1, b1, w2, b2, w3, b3, *, tm):
    mp, k1 = x.shape
    n1, n2, n3 = w1.shape[1], w2.shape[1], w3.shape[1]
    assert mp % tm == 0 and k1 % LANE == 0
    assert w1.shape == (k1, n1) and w2.shape == (n1, n2) and w3.shape == (n2, n3)

    def resident(shape):
        return pl.BlockSpec(shape, lambda i: (0, 0))

    return pl.pallas_call(
        _fc_fused_kernel,
        out_shape=jax.ShapeDtypeStruct((mp, n3), jnp.float32),
        grid=(mp // tm,),
        in_specs=[
            pl.BlockSpec((tm, k1), lambda i: (i, 0)),
            resident((k1, n1)), resident((1, n1)),
            resident((n1, n2)), resident((1, n2)),
            resident((n2, n3)), resident((1, n3)),
        ],
        out_specs=pl.BlockSpec((tm, n3), lambda i: (i, 0)),
        compiler_params=pltpu.CompilerParams(
            dimension_semantics=("parallel",)),
    )(x, w1, b1, w2, b2, w3, b3)


# ----------------------------------------------------------------------------
# One-time parameter preparation (hoisted out of the jitted forward)
# ----------------------------------------------------------------------------
def _conv_band_weights(w_oihw, in_w):
    """PyTorch (Cout, Cin, kh, kw) conv weight -> banded matmul weights
    (kh, in_w*Cin, out_w*Cout):  out[ho, wo*Cout+co] = sum_di x[ho+di] @ band[di]
    reproduces the valid cross-correlation on (w, c)-flattened rows."""
    cout, cin, kh, kw = w_oihw.shape
    out_w = in_w - kw + 1
    wt = jnp.transpose(w_oihw, (2, 3, 1, 0))                  # (kh, kw, Cin, Cout)
    w_idx = jnp.arange(in_w)[:, None]
    wo_idx = jnp.arange(out_w)[None, :]
    dj = w_idx - wo_idx                                       # (W, Wo)
    valid = (dj >= 0) & (dj < kw)
    djc = jnp.clip(dj, 0, kw - 1)
    bands = []
    for di in range(kh):
        g = wt[di][djc]                                       # (W, Wo, Cin, Cout)
        g = jnp.where(valid[:, :, None, None], g, 0.0)
        bands.append(jnp.transpose(g, (0, 2, 1, 3)).reshape(in_w * cin,
                                                            out_w * cout))
    return jnp.stack(bands).astype(jnp.bfloat16)


def prepare_lenet_params(params, image_size=32):
    k = params["conv1_w"].shape[2]                 # 5
    cout2 = params["conv2_w"].shape[0]             # 16
    ho1 = image_size - k + 1                       # 28
    hp1 = ho1 // 2                                 # 14
    ho2 = hp1 - k + 1                              # 10
    hp2 = ho2 // 2                                 # 5
    n1, fc_in = params["fc1_w"].shape              # 120, 400
    n2 = params["fc2_w"].shape[0]                  # 84
    n3 = params["fc3_w"].shape[0]                  # num_classes
    assert fc_in == cout2 * hp2 * hp2

    kp = _round_up(fc_in, LANE)                    # 512
    p1 = _round_up(n1, LANE)
    p2 = _round_up(n2, LANE)
    p3 = _round_up(n3, LANE)

    # fc1 columns are (c, h, w) ordered by the PyTorch flatten; reorder to the
    # (h, w, c) order produced by the NHWC flatten in the forward pass.
    w1 = params["fc1_w"].reshape(n1, cout2, hp2, hp2).transpose(0, 2, 3, 1)
    w1 = w1.reshape(n1, fc_in).T                   # (400, 120)

    def pad2(a, rows, cols):
        return jnp.pad(a, ((0, rows - a.shape[0]), (0, cols - a.shape[1])))

    return {
        "conv1_w": _conv_band_weights(params["conv1_w"], image_size),
        "conv1_b": jnp.tile(params["conv1_b"], ho1).reshape(1, -1).astype(jnp.float32),
        "conv2_w": _conv_band_weights(params["conv2_w"], hp1),
        "conv2_b": jnp.tile(params["conv2_b"], ho2).reshape(1, -1).astype(jnp.float32),
        "fc1_w": pad2(w1, kp, p1).astype(jnp.bfloat16),
        "fc1_b": jnp.pad(params["fc1_b"], (0, p1 - n1)).reshape(1, p1).astype(jnp.float32),
        "fc2_w": pad2(params["fc2_w"].T, p1, p2).astype(jnp.bfloat16),
        "fc2_b": jnp.pad(params["fc2_b"], (0, p2 - n2)).reshape(1, p2).astype(jnp.float32),
        "fc3_w": pad2(params["fc3_w"].T, p2, p3).astype(jnp.bfloat16),
        "fc3_b": jnp.pad(params["fc3_b"], (0, p3 - n3)).reshape(1, p3).astype(jnp.float32),
    }


# ----------------------------------------------------------------------------
# LeNet parameters (deterministic PyTorch-style uniform +-1/sqrt(fan_in))
# ----------------------------------------------------------------------------
def init_lenet_params(key, num_classes=10, image_size=32):
    spatial = ((image_size - 4) // 2 - 4) // 2          # 5 for image_size=32
    fc1_in = 16 * spatial * spatial                     # 400

    def uinit(k, shape, fan_in):
        bound = 1.0 / jnp.sqrt(fan_in)
        return jax.random.uniform(k, shape, jnp.float32, -bound, bound)

    ks = jax.random.split(key, 10)
    return {
        "conv1_w": uinit(ks[0], (6, 3, 5, 5), 3 * 5 * 5),
        "conv1_b": uinit(ks[1], (6,), 3 * 5 * 5),
        "conv2_w": uinit(ks[2], (16, 6, 5, 5), 6 * 5 * 5),
        "conv2_b": uinit(ks[3], (16,), 6 * 5 * 5),
        "fc1_w": uinit(ks[4], (120, fc1_in), fc1_in),
        "fc1_b": uinit(ks[5], (120,), fc1_in),
        "fc2_w": uinit(ks[6], (84, 120), 120),
        "fc2_b": uinit(ks[7], (84,), 120),
        "fc3_w": uinit(ks[8], (num_classes, 84), 84),
        "fc3_b": uinit(ks[9], (num_classes,), 84),
    }


# ----------------------------------------------------------------------------
# Forward pass (module boundary is NCHW like PyTorch)
# ----------------------------------------------------------------------------
def maxpool2x2_nhwc(x):
    # Tiny XLA reshape+max on compact bf16 conv outputs.
    b, h, w, c = x.shape
    return jnp.max(x.reshape(b, h // 2, 2, w // 2, 2, c), axis=(2, 4))


def lenet_forward(prep, x, *, num_classes=10):
    batch, c_in, h, w = x.shape
    k = prep["conv1_w"].shape[0]

    # NCHW -> channels-last rows (B, H, W*C) in bf16 for the MXU.
    xr = x.transpose(0, 2, 3, 1).reshape(batch, h, w * c_in).astype(jnp.bfloat16)

    bt, bp = _conv_batch_tiling(batch)
    if bp != batch:
        xr = jnp.pad(xr, ((0, bp - batch), (0, 0), (0, 0)))

    # conv1 + ReLU (compact (Bp, 28, 28*6) output), 2x2 pool in XLA.
    c1 = conv_band_pallas(xr, prep["conv1_w"], prep["conv1_b"], bt=bt)
    ho1, wo1 = h - k + 1, w - k + 1
    cout1 = c1.shape[-1] // wo1
    p1 = maxpool2x2_nhwc(c1.reshape(bp, ho1, wo1, cout1))         # (Bp,14,14,6)
    hp1, wp1 = ho1 // 2, wo1 // 2

    # conv2 + ReLU, pool.
    x2 = p1.reshape(bp, hp1, wp1 * cout1)                         # (Bp,14,84)
    c2 = conv_band_pallas(x2, prep["conv2_w"], prep["conv2_b"], bt=bt)
    ho2, wo2 = hp1 - k + 1, wp1 - k + 1
    cout2 = c2.shape[-1] // wo2
    p2 = maxpool2x2_nhwc(c2.reshape(bp, ho2, wo2, cout2))         # (Bp,5,5,16)

    # Fused fc1 -> relu -> fc2 -> relu -> fc3 (weights resident in VMEM).
    flat = p2.reshape(bp, -1)                                     # (Bp,400), (h,w,c) order
    kp = prep["fc1_w"].shape[0]
    mp, tm = _fc_m_tiling(bp)
    xfc = jnp.pad(flat, ((0, mp - bp), (0, kp - flat.shape[1])))
    logits = fc_fused_pallas(xfc, prep["fc1_w"], prep["fc1_b"],
                             prep["fc2_w"], prep["fc2_b"],
                             prep["fc3_w"], prep["fc3_b"], tm=tm)
    return logits[:batch, :num_classes]


# ----------------------------------------------------------------------------
if __name__ == "__main__":
    key = jax.random.PRNGKey(0)
    k_params, k_x = jax.random.split(key)

    B, C, H, W = 2, 3, 32, 32  # LeNet requires 3 input channels, 32x32 spatial
    x = jax.random.normal(k_x, (B, C, H, W), jnp.float32)
    params = init_lenet_params(k_params, num_classes=10, image_size=H)
    prep = prepare_lenet_params(params, image_size=H)   # one-time, outside jit

    fwd = jax.jit(lenet_forward)
    logits = fwd(prep, x)
    jax.block_until_ready(logits)

    assert logits.shape == (B, 10), logits.shape
    assert logits.dtype == jnp.float32
    print("KERNEL_OK")
</pallas_src>

<mosaic_0001>
module attributes {stable_mosaic.version = 11 : i64} {
  func.func @_conv_band_kernel(%arg0: i32, %arg1: memref<1x32x96xbf16, #tpu.memory_space<vmem>>, %arg2: memref<5x96x168xbf16, #tpu.memory_space<vmem>>, %arg3: memref<1x168xf32, #tpu.memory_space<vmem>>, %arg4: memref<1x28x168xbf16, #tpu.memory_space<vmem>>) attributes {dimension_semantics = [#tpu.dimension_semantics<parallel>], iteration_bounds = array<i64: 2>, scalar_prefetch = 0 : i64, scratch_operands = 0 : i64, tpu.core_type = #tpu.core_type<tc>, window_params = [{transform_indices = @transform_0, window_bounds = array<i64: 1, 32, 96>}, {pipeline_mode = #tpu.pipeline_mode<synchronous>, transform_indices = @transform_1, window_bounds = array<i64: 5, 96, 168>}, {pipeline_mode = #tpu.pipeline_mode<synchronous>, transform_indices = @transform_2, window_bounds = array<i64: 1, 168>}, {transform_indices = @transform_3, window_bounds = array<i64: 1, 28, 168>}]} {
    %c0 = arith.constant 0 : index
    %c0_0 = arith.constant 0 : index
    %c0_1 = arith.constant 0 : index
    %0 = vector.load %arg1[%c0, %c0_0, %c0_1] : memref<1x32x96xbf16, #tpu.memory_space<vmem>>, vector<1x28x96xbf16>
    %1 = vector.shape_cast %0 : vector<1x28x96xbf16> to vector<28x96xbf16>
    %c0_2 = arith.constant 0 : index
    %c0_3 = arith.constant 0 : index
    %c0_4 = arith.constant 0 : index
    %2 = vector.load %arg2[%c0_2, %c0_3, %c0_4] : memref<5x96x168xbf16, #tpu.memory_space<vmem>>, vector<1x96x168xbf16>
    %3 = vector.shape_cast %2 : vector<1x96x168xbf16> to vector<96x168xbf16>
    %cst = arith.constant dense<0.000000e+00> : vector<28x168xf32>
    %4 = tpu.matmul %1, %3, %cst {dimension_numbers = #tpu.dot_dimension_numbers<[1], [0], [0], [1], [0, 0, 1, 1], [], []>} : vector<28x96xbf16>, vector<96x168xbf16>, vector<28x168xf32> -> vector<28x168xf32>
    %c0_5 = arith.constant 0 : index
    %c1 = arith.constant 1 : index
    %c0_6 = arith.constant 0 : index
    %5 = vector.load %arg1[%c0_5, %c1, %c0_6] : memref<1x32x96xbf16, #tpu.memory_space<vmem>>, vector<1x28x96xbf16>
    %6 = vector.shape_cast %5 : vector<1x28x96xbf16> to vector<28x96xbf16>
    %c1_7 = arith.constant 1 : index
    %c0_8 = arith.constant 0 : index
    %c0_9 = arith.constant 0 : index
    %7 = vector.load %arg2[%c1_7, %c0_8, %c0_9] : memref<5x96x168xbf16, #tpu.memory_space<vmem>>, vector<1x96x168xbf16>
    %8 = vector.shape_cast %7 : vector<1x96x168xbf16> to vector<96x168xbf16>
    %cst_10 = arith.constant dense<0.000000e+00> : vector<28x168xf32>
    %9 = tpu.matmul %6, %8, %cst_10 {dimension_numbers = #tpu.dot_dimension_numbers<[1], [0], [0], [1], [0, 0, 1, 1], [], []>} : vector<28x96xbf16>, vector<96x168xbf16>, vector<28x168xf32> -> vector<28x168xf32>
    %10 = arith.addf %4, %9 : vector<28x168xf32>
    %c0_11 = arith.constant 0 : index
    %c2 = arith.constant 2 : index
    %c0_12 = arith.constant 0 : index
    %11 = vector.load %arg1[%c0_11, %c2, %c0_12] : memref<1x32x96xbf16, #tpu.memory_space<vmem>>, vector<1x28x96xbf16>
    %12 = vector.shape_cast %11 : vector<1x28x96xbf16> to vector<28x96xbf16>
    %c2_13 = arith.constant 2 : index
    %c0_14 = arith.constant 0 : index
    %c0_15 = arith.constant 0 : index
    %13 = vector.load %arg2[%c2_13, %c0_14, %c0_15] : memref<5x96x168xbf16, #tpu.memory_space<vmem>>, vector<1x96x168xbf16>
    %14 = vector.shape_cast %13 : vector<1x96x168xbf16> to vector<96x168xbf16>
    %cst_16 = arith.constant dense<0.000000e+00> : vector<28x168xf32>
    %15 = tpu.matmul %12, %14, %cst_16 {dimension_numbers = #tpu.dot_dimension_numbers<[1], [0], [0], [1], [0, 0, 1, 1], [], []>} : vector<28x96xbf16>, vector<96x168xbf16>, vector<28x168xf32> -> vector<28x168xf32>
    %16 = arith.addf %10, %15 : vector<28x168xf32>
    %c0_17 = arith.constant 0 : index
    %c3 = arith.constant 3 : index
    %c0_18 = arith.constant 0 : index
    %17 = vector.load %arg1[%c0_17, %c3, %c0_18] : memref<1x32x96xbf16, #tpu.memory_space<vmem>>, vector<1x28x96xbf16>
    %18 = vector.shape_cast %17 : vector<1x28x96xbf16> to vector<28x96xbf16>
    %c3_19 = arith.constant 3 : index
    %c0_20 = arith.constant 0 : index
    %c0_21 = arith.constant 0 : index
    %19 = vector.load %arg2[%c3_19, %c0_20, %c0_21] : memref<5x96x168xbf16, #tpu.memory_space<vmem>>, vector<1x96x168xbf16>
    %20 = vector.shape_cast %19 : vector<1x96x168xbf16> to vector<96x168xbf16>
    %cst_22 = arith.constant dense<0.000000e+00> : vector<28x168xf32>
    %21 = tpu.matmul %18, %20, %cst_22 {dimension_numbers = #tpu.dot_dimension_numbers<[1], [0], [0], [1], [0, 0, 1, 1], [], []>} : vector<28x96xbf16>, vector<96x168xbf16>, vector<28x168xf32> -> vector<28x168xf32>
    %22 = arith.addf %16, %21 : vector<28x168xf32>
    %c0_23 = arith.constant 0 : index
    %c4 = arith.constant 4 : index
    %c0_24 = arith.constant 0 : index
    %23 = vector.load %arg1[%c0_23, %c4, %c0_24] : memref<1x32x96xbf16, #tpu.memory_space<vmem>>, vector<1x28x96xbf16>
    %24 = vector.shape_cast %23 : vector<1x28x96xbf16> to vector<28x96xbf16>
    %c4_25 = arith.constant 4 : index
    %c0_26 = arith.constant 0 : index
    %c0_27 = arith.constant 0 : index
    %25 = vector.load %arg2[%c4_25, %c0_26, %c0_27] : memref<5x96x168xbf16, #tpu.memory_space<vmem>>, vector<1x96x168xbf16>
    %26 = vector.shape_cast %25 : vector<1x96x168xbf16> to vector<96x168xbf16>
    %cst_28 = arith.constant dense<0.000000e+00> : vector<28x168xf32>
    %27 = tpu.matmul %24, %26, %cst_28 {dimension_numbers = #tpu.dot_dimension_numbers<[1], [0], [0], [1], [0, 0, 1, 1], [], []>} : vector<28x96xbf16>, vector<96x168xbf16>, vector<28x168xf32> -> vector<28x168xf32>
    %28 = arith.addf %22, %27 : vector<28x168xf32>
    %c0_29 = arith.constant 0 : index
    %c0_30 = arith.constant 0 : index
    %29 = vector.load %arg3[%c0_29, %c0_30] : memref<1x168xf32, #tpu.memory_space<vmem>>, vector<1x168xf32>
    %30 = vector.broadcast %29 : vector<1x168xf32> to vector<28x168xf32>
    %31 = arith.addf %28, %30 : vector<28x168xf32>
    %cst_31 = arith.constant 0.000000e+00 : f32
    %32 = vector.broadcast %cst_31 : f32 to vector<28x168xf32>
    %33 = arith.maximumf %31, %32 : vector<28x168xf32>
    %34 = arith.truncf %33 : vector<28x168xf32> to vector<28x168xbf16>
    %c0_32 = arith.constant 0 : index
    %c0_33 = arith.constant 0 : index
    %c0_34 = arith.constant 0 : index
    %35 = vector.load %arg4[%c0_32, %c0_33, %c0_34] : memref<1x28x168xbf16, #tpu.memory_space<vmem>>, vector<1x28x168xbf16>
    %36 = vector.shape_cast %35 : vector<1x28x168xbf16> to vector<28x168xbf16>
    %37 = vector.shape_cast %34 : vector<28x168xbf16> to vector<1x28x168xbf16>
    tpu.vector_store %arg4[%c0_32, %c0_33, %c0_34], %37 {strides = array<i32>} : memref<1x28x168xbf16, #tpu.memory_space<vmem>>, vector<1x28x168xbf16>,
    return
  }
  func.func @transform_0(%arg0: i32) -> (i32, i32, i32) {
    %c0_i32 = arith.constant 0 : i32
    %c0_i32_0 = arith.constant 0 : i32
    %c0_i32_1 = arith.constant 0 : i32
    return %arg0, %c0_i32, %c0_i32_0 : i32, i32, i32
  }
  func.func @transform_1(%arg0: i32) -> (i32, i32, i32) {
    %c0_i32 = arith.constant 0 : i32
    %c0_i32_0 = arith.constant 0 : i32
    %c0_i32_1 = arith.constant 0 : i32
    %c0_i32_2 = arith.constant 0 : i32
    return %c0_i32, %c0_i32_0, %c0_i32_1 : i32, i32, i32
  }
  func.func @transform_2(%arg0: i32) -> (i32, i32) {
    %c0_i32 = arith.constant 0 : i32
    %c0_i32_0 = arith.constant 0 : i32
    %c0_i32_1 = arith.constant 0 : i32
    return %c0_i32, %c0_i32_0 : i32, i32
  }
  func.func @transform_3(%arg0: i32) -> (i32, i32, i32) {
    %c0_i32 = arith.constant 0 : i32
    %c0_i32_0 = arith.constant 0 : i32
    %c0_i32_1 = arith.constant 0 : i32
    return %arg0, %c0_i32, %c0_i32_0 : i32, i32, i32
  }
}

module attributes {stable_mosaic.version = 11 : i64} {
  func.func @_conv_band_kernel(%arg0: i32, %arg1: memref<1x14x84xbf16, #tpu.memory_space<vmem>>, %arg2: memref<5x84x160xbf16, #tpu.memory_space<vmem>>, %arg3: memref<1x160xf32, #tpu.memory_space<vmem>>, %arg4: memref<1x10x160xbf16, #tpu.memory_space<vmem>>) attributes {dimension_semantics = [#tpu.dimension_semantics<parallel>], iteration_bounds = array<i64: 2>, scalar_prefetch = 0 : i64, scratch_operands = 0 : i64, tpu.core_type = #tpu.core_type<tc>, window_params = [{transform_indices = @transform_0, window_bounds = array<i64: 1, 14, 84>}, {pipeline_mode = #tpu.pipeline_mode<synchronous>, transform_indices = @transform_1, window_bounds = array<i64: 5, 84, 160>}, {pipeline_mode = #tpu.pipeline_mode<synchronous>, transform_indices = @transform_2, window_bounds = array<i64: 1, 160>}, {transform_indices = @transform_3, window_bounds = array<i64: 1, 10, 160>}]} {
    %c0 = arith.constant 0 : index
    %c0_0 = arith.constant 0 : index
    %c0_1 = arith.constant 0 : index
    %0 = vector.load %arg1[%c0, %c0_0, %c0_1] : memref<1x14x84xbf16, #tpu.memory_space<vmem>>, vector<1x10x84xbf16>
    %1 = vector.shape_cast %0 : vector<1x10x84xbf16> to vector<10x84xbf16>
    %c0_2 = arith.constant 0 : index
    %c0_3 = arith.constant 0 : index
    %c0_4 = arith.constant 0 : index
    %2 = vector.load %arg2[%c0_2, %c0_3, %c0_4] : memref<5x84x160xbf16, #tpu.memory_space<vmem>>, vector<1x84x160xbf16>
    %3 = vector.shape_cast %2 : vector<1x84x160xbf16> to vector<84x160xbf16>
    %cst = arith.constant dense<0.000000e+00> : vector<10x160xf32>
    %4 = tpu.matmul %1, %3, %cst {dimension_numbers = #tpu.dot_dimension_numbers<[1], [0], [0], [1], [0, 0, 1, 1], [], []>} : vector<10x84xbf16>, vector<84x160xbf16>, vector<10x160xf32> -> vector<10x160xf32>
    %c0_5 = arith.constant 0 : index
    %c1 = arith.constant 1 : index
    %c0_6 = arith.constant 0 : index
    %5 = vector.load %arg1[%c0_5, %c1, %c0_6] : memref<1x14x84xbf16, #tpu.memory_space<vmem>>, vector<1x10x84xbf16>
    %6 = vector.shape_cast %5 : vector<1x10x84xbf16> to vector<10x84xbf16>
    %c1_7 = arith.constant 1 : index
    %c0_8 = arith.constant 0 : index
    %c0_9 = arith.constant 0 : index
    %7 = vector.load %arg2[%c1_7, %c0_8, %c0_9] : memref<5x84x160xbf16, #tpu.memory_space<vmem>>, vector<1x84x160xbf16>
    %8 = vector.shape_cast %7 : vector<1x84x160xbf16> to vector<84x160xbf16>
    %cst_10 = arith.constant dense<0.000000e+00> : vector<10x160xf32>
    %9 = tpu.matmul %6, %8, %cst_10 {dimension_numbers = #tpu.dot_dimension_numbers<[1], [0], [0], [1], [0, 0, 1, 1], [], []>} : vector<10x84xbf16>, vector<84x160xbf16>, vector<10x160xf32> -> vector<10x160xf32>
    %10 = arith.addf %4, %9 : vector<10x160xf32>
    %c0_11 = arith.constant 0 : index
    %c2 = arith.constant 2 : index
    %c0_12 = arith.constant 0 : index
    %11 = vector.load %arg1[%c0_11, %c2, %c0_12] : memref<1x14x84xbf16, #tpu.memory_space<vmem>>, vector<1x10x84xbf16>
    %12 = vector.shape_cast %11 : vector<1x10x84xbf16> to vector<10x84xbf16>
    %c2_13 = arith.constant 2 : index
    %c0_14 = arith.constant 0 : index
    %c0_15 = arith.constant 0 : index
    %13 = vector.load %arg2[%c2_13, %c0_14, %c0_15] : memref<5x84x160xbf16, #tpu.memory_space<vmem>>, vector<1x84x160xbf16>
    %14 = vector.shape_cast %13 : vector<1x84x160xbf16> to vector<84x160xbf16>
    %cst_16 = arith.constant dense<0.000000e+00> : vector<10x160xf32>
    %15 = tpu.matmul %12, %14, %cst_16 {dimension_numbers = #tpu.dot_dimension_numbers<[1], [0], [0], [1], [0, 0, 1, 1], [], []>} : vector<10x84xbf16>, vector<84x160xbf16>, vector<10x160xf32> -> vector<10x160xf32>
    %16 = arith.addf %10, %15 : vector<10x160xf32>
    %c0_17 = arith.constant 0 : index
    %c3 = arith.constant 3 : index
    %c0_18 = arith.constant 0 : index
    %17 = vector.load %arg1[%c0_17, %c3, %c0_18] : memref<1x14x84xbf16, #tpu.memory_space<vmem>>, vector<1x10x84xbf16>
    %18 = vector.shape_cast %17 : vector<1x10x84xbf16> to vector<10x84xbf16>
    %c3_19 = arith.constant 3 : index
    %c0_20 = arith.constant 0 : index
    %c0_21 = arith.constant 0 : index
    %19 = vector.load %arg2[%c3_19, %c0_20, %c0_21] : memref<5x84x160xbf16, #tpu.memory_space<vmem>>, vector<1x84x160xbf16>
    %20 = vector.shape_cast %19 : vector<1x84x160xbf16> to vector<84x160xbf16>
    %cst_22 = arith.constant dense<0.000000e+00> : vector<10x160xf32>
    %21 = tpu.matmul %18, %20, %cst_22 {dimension_numbers = #tpu.dot_dimension_numbers<[1], [0], [0], [1], [0, 0, 1, 1], [], []>} : vector<10x84xbf16>, vector<84x160xbf16>, vector<10x160xf32> -> vector<10x160xf32>
    %22 = arith.addf %16, %21 : vector<10x160xf32>
    %c0_23 = arith.constant 0 : index
    %c4 = arith.constant 4 : index
    %c0_24 = arith.constant 0 : index
    %23 = vector.load %arg1[%c0_23, %c4, %c0_24] : memref<1x14x84xbf16, #tpu.memory_space<vmem>>, vector<1x10x84xbf16>
    %24 = vector.shape_cast %23 : vector<1x10x84xbf16> to vector<10x84xbf16>
    %c4_25 = arith.constant 4 : index
    %c0_26 = arith.constant 0 : index
    %c0_27 = arith.constant 0 : index
    %25 = vector.load %arg2[%c4_25, %c0_26, %c0_27] : memref<5x84x160xbf16, #tpu.memory_space<vmem>>, vector<1x84x160xbf16>
    %26 = vector.shape_cast %25 : vector<1x84x160xbf16> to vector<84x160xbf16>
    %cst_28 = arith.constant dense<0.000000e+00> : vector<10x160xf32>
    %27 = tpu.matmul %24, %26, %cst_28 {dimension_numbers = #tpu.dot_dimension_numbers<[1], [0], [0], [1], [0, 0, 1, 1], [], []>} : vector<10x84xbf16>, vector<84x160xbf16>, vector<10x160xf32> -> vector<10x160xf32>
    %28 = arith.addf %22, %27 : vector<10x160xf32>
    %c0_29 = arith.constant 0 : index
    %c0_30 = arith.constant 0 : index
    %29 = vector.load %arg3[%c0_29, %c0_30] : memref<1x160xf32, #tpu.memory_space<vmem>>, vector<1x160xf32>
    %30 = vector.broadcast %29 : vector<1x160xf32> to vector<10x160xf32>
    %31 = arith.addf %28, %30 : vector<10x160xf32>
    %cst_31 = arith.constant 0.000000e+00 : f32
    %32 = vector.broadcast %cst_31 : f32 to vector<10x160xf32>
    %33 = arith.maximumf %31, %32 : vector<10x160xf32>
    %34 = arith.truncf %33 : vector<10x160xf32> to vector<10x160xbf16>
    %c0_32 = arith.constant 0 : index
    %c0_33 = arith.constant 0 : index
    %c0_34 = arith.constant 0 : index
    %35 = vector.load %arg4[%c0_32, %c0_33, %c0_34] : memref<1x10x160xbf16, #tpu.memory_space<vmem>>, vector<1x10x160xbf16>
    %36 = vector.shape_cast %35 : vector<1x10x160xbf16> to vector<10x160xbf16>
    %37 = vector.shape_cast %34 : vector<10x160xbf16> to vector<1x10x160xbf16>
    tpu.vector_store %arg4[%c0_32, %c0_33, %c0_34], %37 {strides = array<i32>} : memref<1x10x160xbf16, #tpu.memory_space<vmem>>, vector<1x10x160xbf16>,
    return
  }
  func.func @transform_0(%arg0: i32) -> (i32, i32, i32) {
    %c0_i32 = arith.constant 0 : i32
    %c0_i32_0 = arith.constant 0 : i32
    %c0_i32_1 = arith.constant 0 : i32
    return %arg0, %c0_i32, %c0_i32_0 : i32, i32, i32
  }
  func.func @transform_1(%arg0: i32) -> (i32, i32, i32) {
    %c0_i32 = arith.constant 0 : i32
    %c0_i32_0 = arith.constant 0 : i32
    %c0_i32_1 = arith.constant 0 : i32
    %c0_i32_2 = arith.constant 0 : i32
    return %c0_i32, %c0_i32_0, %c0_i32_1 : i32, i32, i32
  }
  func.func @transform_2(%arg0: i32) -> (i32, i32) {
    %c0_i32 = arith.constant 0 : i32
    %c0_i32_0 = arith.constant 0 : i32
    %c0_i32_1 = arith.constant 0 : i32
    return %c0_i32, %c0_i32_0 : i32, i32
  }
  func.func @transform_3(%arg0: i32) -> (i32, i32, i32) {
    %c0_i32 = arith.constant 0 : i32
    %c0_i32_0 = arith.constant 0 : i32
    %c0_i32_1 = arith.constant 0 : i32
    return %arg0, %c0_i32, %c0_i32_0 : i32, i32, i32
  }
}

module attributes {stable_mosaic.version = 11 : i64} {
  func.func @_fc_fused_kernel(%arg0: i32, %arg1: memref<16x512xbf16, #tpu.memory_space<vmem>>, %arg2: memref<512x128xbf16, #tpu.memory_space<vmem>>, %arg3: memref<1x128xf32, #tpu.memory_space<vmem>>, %arg4: memref<128x128xbf16, #tpu.memory_space<vmem>>, %arg5: memref<1x128xf32, #tpu.memory_space<vmem>>, %arg6: memref<128x128xbf16, #tpu.memory_space<vmem>>, %arg7: memref<1x128xf32, #tpu.memory_space<vmem>>, %arg8: memref<16x128xf32, #tpu.memory_space<vmem>>) attributes {dimension_semantics = [#tpu.dimension_semantics<parallel>], iteration_bounds = array<i64: 2>, scalar_prefetch = 0 : i64, scratch_operands = 0 : i64, tpu.core_type = #tpu.core_type<tc>, window_params = [{transform_indices = @transform_0, window_bounds = array<i64: 16, 512>}, {pipeline_mode = #tpu.pipeline_mode<synchronous>, transform_indices = @transform_1, window_bounds = array<i64: 512, 128>}, {pipeline_mode = #tpu.pipeline_mode<synchronous>, transform_indices = @transform_2, window_bounds = array<i64: 1, 128>}, {pipeline_mode = #tpu.pipeline_mode<synchronous>, transform_indices = @transform_3, window_bounds = array<i64: 128, 128>}, {pipeline_mode = #tpu.pipeline_mode<synchronous>, transform_indices = @transform_4, window_bounds = array<i64: 1, 128>}, {pipeline_mode = #tpu.pipeline_mode<synchronous>, transform_indices = @transform_5, window_bounds = array<i64: 128, 128>}, {pipeline_mode = #tpu.pipeline_mode<synchronous>, transform_indices = @transform_6, window_bounds = array<i64: 1, 128>}, {transform_indices = @transform_7, window_bounds = array<i64: 16, 128>}]} {
    %c0 = arith.constant 0 : index
    %c0_0 = arith.constant 0 : index
    %0 = vector.load %arg1[%c0, %c0_0] : memref<16x512xbf16, #tpu.memory_space<vmem>>, vector<16x512xbf16>
    %c0_1 = arith.constant 0 : index
    %c0_2 = arith.constant 0 : index
    %1 = vector.load %arg2[%c0_1, %c0_2] : memref<512x128xbf16, #tpu.memory_space<vmem>>, vector<512x128xbf16>
    %cst = arith.constant dense<0.000000e+00> : vector<16x128xf32>
    %2 = tpu.matmul %0, %1, %cst {dimension_numbers = #tpu.dot_dimension_numbers<[1], [0], [0], [1], [0, 0, 1, 1], [], []>} : vector<16x512xbf16>, vector<512x128xbf16>, vector<16x128xf32> -> vector<16x128xf32>
    %c0_3 = arith.constant 0 : index
    %c0_4 = arith.constant 0 : index
    %3 = vector.load %arg3[%c0_3, %c0_4] : memref<1x128xf32, #tpu.memory_space<vmem>>, vector<1x128xf32>
    %4 = vector.broadcast %3 : vector<1x128xf32> to vector<16x128xf32>
    %5 = arith.addf %2, %4 : vector<16x128xf32>
    %cst_5 = arith.constant 0.000000e+00 : f32
    %6 = vector.broadcast %cst_5 : f32 to vector<16x128xf32>
    %7 = arith.maximumf %5, %6 : vector<16x128xf32>
    %8 = arith.truncf %7 : vector<16x128xf32> to vector<16x128xbf16>
    %c0_6 = arith.constant 0 : index
    %c0_7 = arith.constant 0 : index
    %9 = vector.load %arg4[%c0_6, %c0_7] : memref<128x128xbf16, #tpu.memory_space<vmem>>, vector<128x128xbf16>
    %cst_8 = arith.constant dense<0.000000e+00> : vector<16x128xf32>
    %10 = tpu.matmul %8, %9, %cst_8 {dimension_numbers = #tpu.dot_dimension_numbers<[1], [0], [0], [1], [0, 0, 1, 1], [], []>} : vector<16x128xbf16>, vector<128x128xbf16>, vector<16x128xf32> -> vector<16x128xf32>
    %c0_9 = arith.constant 0 : index
    %c0_10 = arith.constant 0 : index
    %11 = vector.load %arg5[%c0_9, %c0_10] : memref<1x128xf32, #tpu.memory_space<vmem>>, vector<1x128xf32>
    %12 = vector.broadcast %11 : vector<1x128xf32> to vector<16x128xf32>
    %13 = arith.addf %10, %12 : vector<16x128xf32>
    %cst_11 = arith.constant 0.000000e+00 : f32
    %14 = vector.broadcast %cst_11 : f32 to vector<16x128xf32>
    %15 = arith.maximumf %13, %14 : vector<16x128xf32>
    %16 = arith.truncf %15 : vector<16x128xf32> to vector<16x128xbf16>
    %c0_12 = arith.constant 0 : index
    %c0_13 = arith.constant 0 : index
    %17 = vector.load %arg6[%c0_12, %c0_13] : memref<128x128xbf16, #tpu.memory_space<vmem>>, vector<128x128xbf16>
    %cst_14 = arith.constant dense<0.000000e+00> : vector<16x128xf32>
    %18 = tpu.matmul %16, %17, %cst_14 {dimension_numbers = #tpu.dot_dimension_numbers<[1], [0], [0], [1], [0, 0, 1, 1], [], []>} : vector<16x128xbf16>, vector<128x128xbf16>, vector<16x128xf32> -> vector<16x128xf32>
    %c0_15 = arith.constant 0 : index
    %c0_16 = arith.constant 0 : index
    %19 = vector.load %arg7[%c0_15, %c0_16] : memref<1x128xf32, #tpu.memory_space<vmem>>, vector<1x128xf32>
    %20 = vector.broadcast %19 : vector<1x128xf32> to vector<16x128xf32>
    %21 = arith.addf %18, %20 : vector<16x128xf32>
    %c0_17 = arith.constant 0 : index
    %c0_18 = arith.constant 0 : index
    %22 = vector.load %arg8[%c0_17, %c0_18] : memref<16x128xf32, #tpu.memory_space<vmem>>, vector<16x128xf32>
    tpu.vector_store %arg8[%c0_17, %c0_18], %21 {strides = array<i32>} : memref<16x128xf32, #tpu.memory_space<vmem>>, vector<16x128xf32>,
    return
  }
  func.func @transform_0(%arg0: i32) -> (i32, i32) {
    %c0_i32 = arith.constant 0 : i32
    %c0_i32_0 = arith.constant 0 : i32
    return %arg0, %c0_i32 : i32, i32
  }
  func.func @transform_1(%arg0: i32) -> (i32, i32) {
    %c0_i32 = arith.constant 0 : i32
    %c0_i32_0 = arith.constant 0 : i32
    %c0_i32_1 = arith.constant 0 : i32
    return %c0_i32, %c0_i32_0 : i32, i32
  }
  func.func @transform_2(%arg0: i32) -> (i32, i32) {
    %c0_i32 = arith.constant 0 : i32
    %c0_i32_0 = arith.constant 0 : i32
    %c0_i32_1 = arith.constant 0 : i32
    return %c0_i32, %c0_i32_0 : i32, i32
  }
  func.func @transform_3(%arg0: i32) -> (i32, i32) {
    %c0_i32 = arith.constant 0 : i32
    %c0_i32_0 = arith.constant 0 : i32
    %c0_i32_1 = arith.constant 0 : i32
    return %c0_i32, %c0_i32_0 : i32, i32
  }
  func.func @transform_4(%arg0: i32) -> (i32, i32) {
    %c0_i32 = arith.constant 0 : i32
    %c0_i32_0 = arith.constant 0 : i32
    %c0_i32_1 = arith.constant 0 : i32
    return %c0_i32, %c0_i32_0 : i32, i32
  }
  func.func @transform_5(%arg0: i32) -> (i32, i32) {
    %c0_i32 = arith.constant 0 : i32
    %c0_i32_0 = arith.constant 0 : i32
    %c0_i32_1 = arith.constant 0 : i32
    return %c0_i32, %c0_i32_0 : i32, i32
  }
  func.func @transform_6(%arg0: i32) -> (i32, i32) {
    %c0_i32 = arith.constant 0 : i32
    %c0_i32_0 = arith.constant 0 : i32
    %c0_i32_1 = arith.constant 0 : i32
    return %c0_i32, %c0_i32_0 : i32, i32
  }
  func.func @transform_7(%arg0: i32) -> (i32, i32) {
    %c0_i32 = arith.constant 0 : i32
    %c0_i32_0 = arith.constant 0 : i32
    return %arg0, %c0_i32 : i32, i32
  }
}

</mosaic_0001>

<bundles_post_ra>
// kernel: lenet_forward.3
= control target key start
LH: loop header
LB: loop body
LE: loop exit
PB: predicated region body
PF: predicated region fallthrough
CT: control target
= control target key end

     0   :  { %s1367_s12 = smov 0   ;;  %s1633_s0 = inlined_call_operand.vmem [shape: bf16[2,32,96], index: 0, kind: input, shape index: {}]   ;;  %s1634_s1 = inlined_call_operand.vmem [shape: bf16[5,96,168], index: 1, kind: input, shape index: {}]   ;;  %s1635_s2 = inlined_call_operand.vmem [shape: f32[1,168], index: 2, kind: input, shape index: {}]   ;;  %s1636_s3 = inlined_call_operand.vmem [shape: bf16[2,28,168], index: 3, kind: output, shape index: {}]  }
   0x1 LB: > { %s1044_s13 = sadd.s32 4294967295, %s1344_s12   ;;  %p1048_p0 = scmp.ge.s32.totalorder %s1344_s12, 1  ;;  %s1344_s12 = sphi %s1367_s12, %s13_s12  }
   0x2   : > { %p137_p1 = scmp.lt.s32.totalorder %s1344_s12, 3 }
   0x4   : > { %p138_p2 = pnand %p1048_p0, %p137_p1 }
   0x5   : > { %v1242_v0 = vld [vmem:[%s1634_s1 + $0x64] ss:$8 sps:$4 sm:$0xff] (!%p138_p2)   ;;  %v1346_v2 = vmov (!%p138_p2), 0   ;;  %v1246_v3 = vld [vmem:[%s1634_s1 + $0x60] ss:$8 sps:$4 sm:$0xff] (!%p138_p2)   ;;  %p161_p3 = scmp.lt.s32.totalorder (!%p138_p2), %s1044_s13, 1 }
   0x6   : > { %141 = sbr.rel (%p138_p2) target bundleno = 305 (0x131), region = 32  ;;  %v1244_v1 = vld [vmem:[%s1634_s1 + $0xc4] ss:$8 sps:$4 sm:$0xff] (!%p138_p2)   ;;  %327 = vmatprep.mubr.bf16.mxu1 (!%p138_p2), %v1346_v2  ;;  %588 = vmatprep.mubr.bf16.mxu0 (!%p138_p2), %v1346_v2  ;;  %v1247_v4 = vld [vmem:[%s1634_s1 + $0xc0] ss:$8 sps:$4 sm:$0xff] (!%p138_p2)   ;;  %vm486_vm0 = vcmask (!%p138_p2), 1046528  }
   0x7   : > { %295 = vmatprep.subr.bf16.mxu1 (!%p138_p2), %v1242_v0  ;;  %556 = vmatprep.subr.bf16.mxu0 (!%p138_p2), %v1244_v1  ;;  %v1248_v5 = vld [vmem:[%s1634_s1 + $0x74] ss:$8 sps:$4 sm:$0xff] (!%p138_p2)   ;;  %v1252_v7 = vld [vmem:[%s1634_s1 + $0x70] ss:$8 sps:$4 sm:$0xff] (!%p138_p2)   ;;  %v1254_v9 = vld [vmem:[%s1634_s1 + $0x84] ss:$8 sps:$4 sm:$0xff] (!%p138_p2)  }
   0x8   : > { %296 = vmatpush1.bf16.msra.mxu1 (!%p138_p2), %v1246_v3  ;;  %557 = vmatpush1.bf16.msra.mxu0 (!%p138_p2), %v1247_v4  ;;  %v1250_v6 = vld [vmem:[%s1634_s1 + $0xd4] ss:$8 sps:$4 sm:$0xff] (!%p138_p2)   ;;  %v1253_v8 = vld [vmem:[%s1634_s1 + $0xd0] ss:$8 sps:$4 sm:$0xff] (!%p138_p2)   ;;  %v1256_v10 = vld [vmem:[%s1634_s1 + $0xe4] ss:$8 sps:$4 sm:$0xff] (!%p138_p2)  }
   0x9   : > { %297 = vmatprep.subr.bf16.mxu1 (!%p138_p2), %v1248_v5  ;;  %558 = vmatprep.subr.bf16.mxu0 (!%p138_p2), %v1250_v6  ;;  %v1258_v11 = vld [vmem:[%s1634_s1 + $0x80] ss:$8 sps:$4 sm:$0xff] (!%p138_p2)   ;;  %v1260_v13 = vld [vmem:[%s1634_s1 + $0x94] ss:$8 sps:$4 sm:$0xff] (!%p138_p2)   ;;  %v1264_v15 = vld [vmem:[%s1634_s1 + $0x90] ss:$8 sps:$4 sm:$0xff] (!%p138_p2)  }
   0xa   : > { %v1259_v12 = vld [vmem:[%s1634_s1 + $0xe0] ss:$8 sps:$4 sm:$0xff] (!%p138_p2)   ;;  %v1262_v14 = vld [vmem:[%s1634_s1 + $0xf4] ss:$8 sps:$4 sm:$0xff] (!%p138_p2)   ;;  %v1265_v16 = vld [vmem:[%s1634_s1 + $0xf0] ss:$8 sps:$4 sm:$0xff] (!%p138_p2)  }
   0xb   : > { %v1266_v17 = vld [vmem:[%s1634_s1 + $0xa4] ss:$8 sps:$4 sm:$0xff] (!%p138_p2)   ;;  %v1270_v19 = vld [vmem:[%s1634_s1 + $0xa0] ss:$8 sps:$4 sm:$0xff] (!%p138_p2)   ;;  %v1272_v21 = vld [vmem:[%s1634_s1 + $0xb4] ss:$8 sps:$4 sm:$0xff] (!%p138_p2)  }
   0xc   : > { %298 = vmatpush1.bf16.msra.mxu1 (!%p138_p2), %v1252_v7  ;;  %559 = vmatpush1.bf16.msra.mxu0 (!%p138_p2), %v1253_v8  ;;  %v1268_v18 = vld [vmem:[%s1634_s1 + $0x104] ss:$8 sps:$4 sm:$0xff] (!%p138_p2)   ;;  %v1271_v20 = vld [vmem:[%s1634_s1 + $0x100] ss:$8 sps:$4 sm:$0xff] (!%p138_p2)   ;;  %v1274_v22 = vld [vmem:[%s1634_s1 + $0x114] ss:$8 sps:$4 sm:$0xff] (!%p138_p2)  }
   0xd   : > { %s1638_s13 = smov (!%p161_p3, %s1044_s13), 1  ;;  %299 = vmatprep.subr.bf16.mxu1 %v1254_v9  ;;  %560 = vmatprep.subr.bf16.mxu0 %v1256_v10  ;;  %v1276_v23 = vld [vmem:[%s1634_s1 + $0xb0] ss:$8 sps:$4 sm:$0xff]   ;;  %v1280_v32 = vld [vmem:[%s1634_s1 + $0x4] ss:$8 sps:$4 sm:$0xff]   ;;  %vm288_vm1 = vcmask 785408  }
   0xe   : > { %s1183_s23 = sshll.u32 %s1638_s13, 4  ;;  %v1277_v28 = vld [vmem:[%s1634_s1 + $0x110] ss:$8 sps:$4 sm:$0xff]   ;;  %v1283_v33 = vld [vmem:[%s1634_s1 + $0x124] ss:$8 sps:$4 sm:$0xff]   ;;  %vm796_vm4 = vcmask 1045504  }
   0xf   : > { %s1447_s5 = scalar_lea.vmem %s1633_s0, %s1183_s23  ;;  %v1281_v40 = vld [vmem:[%s1634_s1 + $0x120] ss:$8 sps:$4 sm:$0xff]   ;;  %vm212_vm2 = vsmask.f32 7424  ;;  %v1293_v44 = vld [vmem:[%s1634_s1 + $0x134] ss:$8 sps:$4 sm:$0xff]  }
  0x10   : > { %300 = vmatpush1.bf16.msra.mxu1 %v1258_v11  ;;  %561 = vmatpush1.bf16.msra.mxu0 %v1259_v12  ;;  %v172_v24 = vld [vmem:[%s1447_s5] sm:$0xf]  ;;  %v1460_v25 = vld [vmem:[%s1447_s5 + $0x4] sm:$0xf]  ;;  %v1463_v26 = vld [vmem:[%s1447_s5 + $0x8] sm:$0xf] }
  0x11   : > { %301 = vmatprep.subr.bf16.mxu1 %v1260_v13  ;;  %562 = vmatprep.subr.bf16.mxu0 %v1262_v14  ;;  %v188_v27 = vld [vmem:[%s1447_s5 + $0xc] sm:$0x7]  ;;  %v1470_v29 = vcombine.low %v172_v24, %v1460_v25  ;;  %v469_v31 = vld [vmem:[%s1447_s5] sm:$0xe]  ;;  %v1290_v47 = vld [vmem:[%s1634_s1 + $0x14] ss:$8 sps:$4 sm:$0xff]  }
  0x12   : > { %v1066_v30 = vcombine.low %v1463_v26, %v188_v27  ;;  %v1481_v34 = vcombine.low %v469_v31, %v1460_v25  ;;  %v1278_v45 = vld [vmem:[%s1634_s1] ss:$8 sps:$4 sm:$0xff]   ;;  %v617_v49 = vld [vmem:[%s1447_s5 + $0xc] sm:$0xf]  ;;  %v1291_v50 = vld [vmem:[%s1634_s1 + $0x130] ss:$8 sps:$4 sm:$0xff]  }
  0x13   : > { %v214_v35 = vshrl.u32 %v1470_v29, 16  ;;  %v216_v36 = vshll.u32 %v1470_v29, 16  ;;  %v1299_v51 = vld [vmem:[%s1634_s1 + $0x144] ss:$8 sps:$4 sm:$0xff]   ;;  %v1288_v53 = vld [vmem:[%s1634_s1 + $0x10] ss:$8 sps:$4 sm:$0xff]   ;;  %v1516_v55 = vcombine.low %v1463_v26, %v617_v49 }
  0x14   : > { %302 = vmatpush1.bf16.msra.mxu1 %v1264_v15  ;;  %563 = vmatpush1.bf16.msra.mxu0 %v1265_v16  ;;  %v221_v37 = vshll.u32 %v1066_v30, 16  ;;  %v488_v38 = vrot.slane %v1066_v30, 1  ;;  %v487_v39 = vrot.slane %v1481_v34, 1  ;;  %v225_v52 = vshrl.u32 %v1066_v30, 16  ;;  %v1296_v54 = vld [vmem:[%s1634_s1 + $0x24] ss:$8 sps:$4 sm:$0xff]  }
  0x15   : > { %303 = vmatprep.subr.bf16.mxu1 %v1266_v17  ;;  %564 = vmatprep.subr.bf16.mxu0 %v1268_v18  ;;  %v218_v41 = vrot.slane %v216_v36, 1  ;;  %v1297_v56 = vld [vmem:[%s1634_s1 + $0x140] ss:$8 sps:$4 sm:$0xff]   ;;  %v1305_v57 = vld [vmem:[%s1634_s1 + $0x154] ss:$8 sps:$4 sm:$0xff]   ;;  %v636_v61 = vshrl.u32 %v1481_v34, 16 }
  0x16   : > { %v223_v42 = vrot.slane %v221_v37, 1  ;;  %v489_v43 = vsel %vm486_vm0, %v487_v39, %v488_v38  ;;  %v1294_v59 = vld [vmem:[%s1634_s1 + $0x20] ss:$8 sps:$4 sm:$0xff]   ;;  %v1302_v60 = vld [vmem:[%s1634_s1 + $0x34] ss:$8 sps:$4 sm:$0xff]   ;;  %v639_v62 = vshll.u32 %v1481_v34, 16 }
  0x17   : > { %v219_v46 = vor.u32 %v218_v41, %v214_v35  ;;  %v1303_v63 = vld [vmem:[%s1634_s1 + $0x150] ss:$8 sps:$4 sm:$0xff]   ;;  %v644_v0 = vshrl.u32 %v1516_v55, 16  ;;  %v647_v1 = vshll.u32 %v1516_v55, 16  ;;  %v1311_v3 = vld [vmem:[%s1634_s1 + $0x164] ss:$8 sps:$4 sm:$0xff]  }
  0x18   : > { %304 = vmatpush1.bf16.msra.mxu1 %v1270_v19  ;;  %565 = vmatpush1.bf16.msra.mxu0 %v1271_v20  ;;  %v227_v58 = vor.u32 %v225_v52, %v223_v42  ;;  %v1300_v4 = vld [vmem:[%s1634_s1 + $0x30] ss:$8 sps:$4 sm:$0xff]   ;;  %v1308_v5 = vld [vmem:[%s1634_s1 + $0x44] ss:$8 sps:$4 sm:$0xff]   ;;  %v638_v6 = vrot.slane %v636_v61, 1  ;;  %v641_v7 = vrot.slane %v639_v62, 2 }
  0x19   : > { %305 = vmatprep.subr.bf16.mxu1 %v1272_v21  ;;  %566 = vmatprep.subr.bf16.mxu0 %v1274_v22  ;;  %v224_v48 = vsel %vm212_vm2, %v219_v46, %v223_v42  ;;  %v1309_v8 = vld [vmem:[%s1634_s1 + $0x160] ss:$8 sps:$4 sm:$0xff]   ;;  %v646_v9 = vrot.slane %v644_v0, 1  ;;  %v649_v10 = vrot.slane %v647_v1, 2  ;;  %v1317_v11 = vld [vmem:[%s1634_s1 + $0x174] ss:$8 sps:$4 sm:$0xff]  }
  0x1a   : > { %v1306_v12 = vld [vmem:[%s1634_s1 + $0x40] ss:$8 sps:$4 sm:$0xff]   ;;  %v1314_v13 = vld [vmem:[%s1634_s1 + $0x54] ss:$8 sps:$4 sm:$0xff]   ;;  %v1315_v14 = vld [vmem:[%s1634_s1 + $0x170] ss:$8 sps:$4 sm:$0xff]   ;;  %v642_v15 = vor.u32 %v641_v7, %v638_v6 }
  0x1b   : > { %v650_v16 = vor.u32 %v649_v10, %v646_v9  ;;  %vm634_vm3 = vsmask.f32 6400  ;;  %v1320_v17 = vld [vmem:[%s1634_s1 + $0x184] ss:$8 sps:$4 sm:$0xff]   ;;  %v1312_v18 = vld [vmem:[%s1634_s1 + $0x50] ss:$8 sps:$4 sm:$0xff]  }
  0x1c   : > { %306 = vmatpush1.bf16.msra.mxu1 %v1276_v23  ;;  %567 = vmatpush1.bf16.msra.mxu0 %v1277_v28  ;;  %v1318_v20 = vld [vmem:[%s1634_s1 + $0x180] ss:$8 sps:$4 sm:$0xff]   ;;  %v1323_v21 = vld [vmem:[%s1634_s1 + $0x194] ss:$8 sps:$4 sm:$0xff]   ;;  %v1321_v22 = vld [vmem:[%s1634_s1 + $0x190] ss:$8 sps:$4 sm:$0xff]  }
  0x1d   : > { %416 = vmatprep.subr.bf16.mxu1 %v1280_v32  ;;  %718 = vmatprep.subr.bf16.mxu0 %v1283_v33  ;;  %v651_v19 = vsel %vm634_vm3, %v642_v15, %v650_v16  ;;  %v1327_v23 = vld [vmem:[%s1634_s1 + $0x1a4] ss:$8 sps:$4 sm:$0xff]   ;;  %v1325_v27 = vld [vmem:[%s1634_s1 + $0x1a0] ss:$8 sps:$4 sm:$0xff]   ;;  %v1328_v30 = vld [vmem:[%s1634_s1 + $0x1b0] ss:$8 sps:$4 sm:$0xff]  }
  0x1e   : > { %v175_v24 = vld [vmem:[%s1447_s5 + $0xc] sm:$0x3]  ;;  %v779_v31 = vld [vmem:[%s1447_s5] sm:$0xc]  ;;  %v1336_v34 = vld [vmem:[%s1634_s1 + $0x1d4] ss:$8 sps:$4 sm:$0xff]  }
  0x1f   : > { %1121 = vmatmul.mubr.msk.bf16.vlgmr.msra.gmra.mrb[0].mxu0 %vm288_vm1, %v489_v43  ;;  %1079 = vmatmul.mubr.msk.bf16.vlgmr.msra.gmra.mrb[0].mxu1 %vm288_vm1, %v224_v48  ;;  %v1081_v28 = vcombine.low %v1463_v26, %v175_v24  ;;  %v1333_v26 = vld [vmem:[%s1634_s1 + $0x1c4] ss:$8 sps:$4 sm:$0xff]   ;;  %v1331_v32 = vld [vmem:[%s1634_s1 + $0x1c0] ss:$8 sps:$4 sm:$0xff]   ;;  %v1162_v33 = vcombine.low %v779_v31, %v1460_v25  ;;  %v798_v36 = vrot.slane %v1516_v55, 2  ;;  %v929_v48 = vlaneseq  ;;  %s1184_s17 = sshll.u32 %s1638_s13, 5 }
  0x20   : > { %719 = vmatpush1.bf16.msra.mxu0 %v1281_v40  ;;  %598 = vmatprep.mubr.bf16.mxu0 %v1346_v2  ;;  %vm979_vm5 = vcmask 1043456   ;;  %vm980_vm6 = vcmask 326660   ;;  %vm985_vm7 = vcmask 1041408   ;;  %s170_s20 = scalar_lea.vmem %s1636_s3, %s1184_s17  ;;  %vm986_vm9 = vcmask 324612  }
  0x21   : > { %720 = vmatprep.subr.bf16.mxu0 %v1293_v44  ;;  %417 = vmatpush1.bf16.msra.mxu1 %v1278_v45  ;;  %v797_v35 = vrot.slane %v1162_v33, 2  ;;  %vm981_vm8 = vmor %vm980_vm6, %vm979_vm5 }
  0x22   : > { %337 = vmatprep.mubr.bf16.mxu1 %v1346_v2  ;;  %418 = vmatprep.subr.bf16.mxu1 %v1290_v47  ;;  %vm987_vm10 = vmor %vm986_vm9, %vm985_vm7 }
  0x23   : > { %v799_v25 = vsel %vm796_vm4, %v797_v35, %v798_v36 }
  0x24   : > { %721 = vmatpush1.bf16.msra.mxu0 %v1291_v50 }
  0x25   : > { %722 = vmatprep.subr.bf16.mxu0 %v1299_v51  ;;  %419 = vmatpush1.bf16.msra.mxu1 %v1288_v53 }
  0x26   : > { %420 = vmatprep.subr.bf16.mxu1 %v1296_v54  ;;  %v930_v54 = vshrl.u32 %v929_v48, 7 }
  0x27   : > { %1122 = vmatmul.mubr.msk.bf16.gmra.mrb[4].mxu0 %vm288_vm1, %v488_v38  ;;  %1080 = vmatmul.mubr.msk.bf16.gmra.mrb[4].mxu1 %vm288_vm1, %v227_v58 }
  0x28   : > { %723 = vmatpush1.bf16.msra.mxu0 %v1297_v56  ;;  %750 = vmatprep.mubr.bf16.mxu0 %v1346_v2  ;;  %v931_v55 = vsub.s32 0, %v930_v54  ;;  %v927_v56 = vld [vmem:[%s1635_s2] sm:$0x3] }
  0x29   : > { %724 = vmatprep.subr.bf16.mxu0 %v1305_v57  ;;  %421 = vmatpush1.bf16.msra.mxu1 %v1294_v59  ;;  %v935_v57 = vsub.s32 1, %v930_v54 }
  0x2a   : > { %448 = vmatprep.mubr.bf16.mxu1 %v1346_v2  ;;  %422 = vmatprep.subr.bf16.mxu1 %v1302_v60  ;;  %v932_v58 = vrot.slane %v927_v56, %v931_v55 }
  0x2b   : > { %v936_v60 = vrot.slane %v927_v56, %v935_v57 }
  0x2c   : > { %725 = vmatpush1.bf16.msra.mxu0 %v1303_v63 }
  0x2d   : > { %726 = vmatprep.subr.bf16.mxu0 %v1311_v3  ;;  %423 = vmatpush1.bf16.msra.mxu1 %v1300_v4 }
  0x2e   : > { %424 = vmatprep.subr.bf16.mxu1 %v1308_v5 }
  0x30   : > { %727 = vmatpush1.bf16.msra.mxu0 %v1309_v8 }
  0x31   : > { %728 = vmatprep.subr.bf16.mxu0 %v1317_v11  ;;  %425 = vmatpush1.bf16.msra.mxu1 %v1306_v12 }
  0x32   : > { %426 = vmatprep.subr.bf16.mxu1 %v1314_v13 }
  0x34   : > { %729 = vmatpush1.bf16.msra.mxu0 %v1315_v14 }
  0x35   : > { %866 = vmatprep.subr.bf16.mxu0 %v1320_v17  ;;  %427 = vmatpush1.bf16.msra.mxu1 %v1312_v18 }
  0x36   : > { %1189 = vmatprep.subr.bf16.mxu1 %v1320_v17 }
  0x37   : > { %1148 = vmatmul.mubr.msk.bf16.vlgmr.msra.gmra.mrb[0].mxu0 %vm288_vm1, %v651_v19 }
  0x38   : > { %867 = vmatpush1.bf16.msra.mxu0 %v1318_v20  ;;  %760 = vmatprep.mubr.bf16.mxu0 %v1346_v2 }
  0x39   : > { %1094 = vmatmul.mubr.msk.bf16.vlgmr.msra.gmra.mrb[0].mxu1 %vm288_vm1, %v1470_v29  ;;  %868 = vmatprep.subr.bf16.mxu0 %v1323_v21  ;;  %v1330_v29 = vld [vmem:[%s1634_s1 + $0x1b4] ss:$8 sps:$4 sm:$0xff]  }
  0x3a   : > { %1195 = vmatpush1.bf16.msra.mxu1 %v1318_v20  ;;  %458 = vmatprep.mubr.bf16.mxu1 %v1346_v2 }
  0x3b   : > { %1190 = vmatprep.subr.bf16.mxu1 %v1323_v21 }
  0x3c   : > { %869 = vmatpush1.bf16.msra.mxu0 %v1321_v22 }
  0x3d   : > { %870 = vmatprep.subr.bf16.mxu0 %v1327_v23 }
  0x3e   : > { %1196 = vmatpush1.bf16.msra.mxu1 %v1321_v22 }
  0x3f   : > { %1149 = vmatmul.mubr.msk.bf16.gmra.mrb[4].mxu0 %vm288_vm1, %v650_v16  ;;  %1191 = vmatprep.subr.bf16.mxu1 %v1327_v23 }
  0x40   : > { %871 = vmatpush1.bf16.msra.mxu0 %v1325_v27  ;;  %898 = vmatprep.mubr.bf16.mxu0 %v1346_v2 }
  0x41   : > { %1095 = vmatmul.mubr.msk.bf16.gmra.mrb[4].mxu1 %vm288_vm1, %v1081_v28  ;;  %872 = vmatprep.subr.bf16.mxu0 %v1330_v29 }
  0x42   : > { %1197 = vmatpush1.bf16.msra.mxu1 %v1325_v27  ;;  %908 = vmatprep.mubr.bf16.mxu1 %v1346_v2  ;;  %v1334_v2 = vld [vmem:[%s1634_s1 + $0x1d0] ss:$8 sps:$4 sm:$0xff]  }
  0x43   : > { %1192 = vmatprep.subr.bf16.mxu1 %v1330_v29 }
  0x44   : > { %873 = vmatpush1.bf16.msra.mxu0 %v1328_v30 }
  0x45   : > { %874 = vmatprep.subr.bf16.mxu0 %v1333_v26 }
  0x46   : > { %1198 = vmatpush1.bf16.msra.mxu1 %v1328_v30 }
  0x47   : > { %1193 = vmatprep.subr.bf16.mxu1 %v1333_v26 }
  0x48   : > { %875 = vmatpush1.bf16.msra.mxu0 %v1331_v32 }
  0x49   : > { %876 = vmatprep.subr.bf16.mxu0 %v1336_v34 }
  0x4a   : > { %1199 = vmatpush1.bf16.msra.mxu1 %v1331_v32 }
  0x4b   : > { %1194 = vmatprep.subr.bf16.mxu1 %v1336_v34 }
  0x4c   : > { %877 = vmatpush1.bf16.msra.mxu0 %v1334_v2 }
  0x4e   : > { %1200 = vmatpush1.bf16.msra.mxu1 %v1334_v2 }
  0x4f   : > { %1175 = vmatmul.mubr.msk.bf16.vlgmr.msra.gmra.mrb[0].mxu0 %vm288_vm1, %v799_v25 }
  0x51   : > { %1176 = vmatmul.mubr.msk.bf16.vlgmr.msra.gmra.mrb[8].mxu1 %vm288_vm1, %v798_v36 }
 0x10c   : > { %v450_v37 = vpop.f32.mrb[0].mxu1 }
 0x10d   : > { %v452_v38 = vpop.f32.mrb[1].mxu1 }
 0x10e   : > { %v454_v39 = vpop.f32.mrb[2].mxu1 }
 0x10f   : > { %v456_v40 = vpop.f32.mrb[3].mxu1 }
 0x112   : > { %v762_v41 = vpop.f32.mrb[4].mxu0 }
 0x113   : > { %v764_v42 = vpop.f32.mrb[5].mxu0 }
 0x114   : > { %v460_v43 = vpop.f32.mrb[4].mxu1  ;;  %v766_v44 = vpop.f32.mrb[6].mxu0 }
 0x115   : > { %v1205_v45 = vadd.f32 %v762_v41, %v460_v43  ;;  %v462_v46 = vpop.f32.mrb[5].mxu1  ;;  %v768_v47 = vpop.f32.mrb[7].mxu0 }
 0x116   : > { %v1207_v49 = vadd.f32 %v764_v42, %v462_v46  ;;  %v464_v50 = vpop.f32.mrb[6].mxu1 }
 0x117   : > { %v1209_v51 = vadd.f32 %v766_v44, %v464_v50  ;;  %v466_v52 = vpop.f32.mrb[7].mxu1 }
 0x118   : > { %v1211_v53 = vadd.f32 %v768_v47, %v466_v52 }
 0x122   : > { %v900_v59 = vpop.f32.mrb[0].mxu0 }
 0x123   : > { %v1201_v61 = vadd.f32 %v900_v59, %v450_v37  ;;  %v902_v62 = vpop.f32.mrb[1].mxu0 }
 0x124   : > { %v910_v63 = vpop.f32.mrb[8].mxu1  ;;  %v1202_v0 = vadd.f32 %v902_v62, %v452_v38  ;;  %v904_v1 = vpop.f32.mrb[2].mxu0 }
 0x125   : > { %v939_v3 = vadd.f32 %v1201_v61, %v932_v58  ;;  %v1206_v4 = vadd.f32 %v1205_v45, %v910_v63  ;;  %v912_v5 = vpop.f32.mrb[9].mxu1  ;;  %v1203_v6 = vadd.f32 %v904_v1, %v454_v39  ;;  %v906_v7 = vpop.f32.mrb[3].mxu0 }
 0x126   : > { %v940_v8 = vadd.f32 %v1202_v0, %v936_v60  ;;  %v1208_v9 = vadd.f32 %v1207_v49, %v912_v5  ;;  %v914_v10 = vpop.f32.mrb[10].mxu1  ;;  %v1204_v11 = vadd.f32 %v906_v7, %v456_v40 }
 0x127   : > { %v947_v12 = vmax.f32 %v939_v3, 0.0  ;;  %v943_v13 = vadd.f32 %v1206_v4, %v932_v58  ;;  %v941_v14 = vadd.f32 %v1203_v6, %v932_v58  ;;  %v1210_v15 = vadd.f32 %v1209_v51, %v914_v10  ;;  %v916_v16 = vpop.f32.mrb[11].mxu1 }
 0x128   : > { %v948_v17 = vmax.f32 %v940_v8, 0.0  ;;  %v944_v18 = vadd.f32 %v1208_v9, %v936_v60  ;;  %v942_v19 = vadd.f32 %v1204_v11, %v936_v60  ;;  %v1212_v20 = vadd.f32 %v1211_v53, %v916_v16 }
 0x129   : > { %v951_v21 = vmax.f32 %v943_v13, 0.0  ;;  %v949_v22 = vmax.f32 %v941_v14, 0.0  ;;  %v945_v23 = vadd.f32 %v1210_v15, %v932_v58 }
 0x12a   : > { %v1185_v24 = vpack.c.bf16 %v948_v17, %v947_v12  ;;  %v952_v27 = vmax.f32 %v944_v18, 0.0  ;;  %v950_v28 = vmax.f32 %v942_v19, 0.0  ;;  %v946_v29 = vadd.f32 %v1212_v20, %v936_v60 }
 0x12b   : > { %v953_v30 = vmax.f32 %v945_v23, 0.0 }
 0x12c   : > { %982 = vst.msk [vmem:[%s170_s20] sm:$0xff] %vm981_vm8, %v1185_v24  ;;  %v1187_v26 = vpack.c.bf16 %v952_v27, %v951_v21  ;;  %v1186_v31 = vpack.c.bf16 %v950_v28, %v949_v22  ;;  %v954_v32 = vmax.f32 %v946_v29, 0.0 }
 0x12e   : > { %984 = vst.msk [vmem:[%s170_s20 + $0x10] sm:$0xff] %vm981_vm8, %v1187_v26  ;;  %983 = vst.msk [vmem:[%s170_s20 + $0x8] sm:$0xff] %vm981_vm8, %v1186_v31  ;;  %v1188_v33 = vpack.c.bf16 %v954_v32, %v953_v30 }
 0x130   : > { %988 = vst.msk [vmem:[%s170_s20 + $0x18] sm:$0x33] %vm987_vm10, %v1188_v33 }
 0x131 PF: > { %s13_s12 = sadd.s32 1, %s1344_s12  }
 0x132   : > { %p10_p4 = scmp.ge.s32.totalorder %s13_s12, 4  }
 0x134   :  { %12 = sbr.rel (!%p10_p4) target bundleno = 1 (0x1), region = 66 }

// kernel: lenet_forward.4
= control target key start
LH: loop header
LB: loop body
LE: loop exit
PB: predicated region body
PF: predicated region fallthrough
CT: control target
= control target key end

     0   :  { %s1195_s12 = smov 0   ;;  %s1420_s0 = inlined_call_operand.vmem [shape: bf16[2,14,84], index: 0, kind: input, shape index: {}]   ;;  %s1421_s1 = inlined_call_operand.vmem [shape: bf16[5,84,160], index: 1, kind: input, shape index: {}]   ;;  %s1422_s2 = inlined_call_operand.vmem [shape: f32[1,160], index: 2, kind: input, shape index: {}]   ;;  %s1423_s3 = inlined_call_operand.vmem [shape: bf16[2,10,160], index: 3, kind: output, shape index: {}]  }
   0x1 LB: > { %s915_s13 = sadd.s32 4294967295, %s1172_s12   ;;  %p919_p0 = scmp.ge.s32.totalorder %s1172_s12, 1  ;;  %s1172_s12 = sphi %s1195_s12, %s13_s12  }
   0x2   : > { %p137_p1 = scmp.lt.s32.totalorder %s1172_s12, 3 }
   0x4   : > { %p138_p2 = pnand %p919_p0, %p137_p1 }
   0x5   : > { %v1076_v0 = vld [vmem:[%s1421_s1 + $0x5c] ss:$8 sps:$4 sm:$0xff] (!%p138_p2)   ;;  %v1174_v2 = vmov (!%p138_p2), 0   ;;  %v1080_v3 = vld [vmem:[%s1421_s1 + $0x58] ss:$8 sps:$4 sm:$0xff] (!%p138_p2)   ;;  %p161_p3 = scmp.lt.s32.totalorder (!%p138_p2), %s915_s13, 1 }
   0x6   : > { %141 = sbr.rel (%p138_p2) target bundleno = 303 (0x12f), region = 32  ;;  %v1078_v1 = vld [vmem:[%s1421_s1 + $0xb4] ss:$8 sps:$4 sm:$0xff] (!%p138_p2)   ;;  %308 = vmatprep.mubr.bf16.mxu1 (!%p138_p2), %v1174_v2  ;;  %542 = vmatprep.mubr.bf16.mxu0 (!%p138_p2), %v1174_v2  ;;  %v1081_v4 = vld [vmem:[%s1421_s1 + $0xb0] ss:$8 sps:$4 sm:$0xff] (!%p138_p2)   ;;  %vm269_vm0 = vcmask (!%p138_p2), 1041408  }
   0x7   : > { %276 = vmatprep.subr.bf16.mxu1 (!%p138_p2), %v1076_v0  ;;  %510 = vmatprep.subr.bf16.mxu0 (!%p138_p2), %v1078_v1  ;;  %v1082_v5 = vld [vmem:[%s1421_s1 + $0x6c] ss:$8 sps:$4 sm:$0xff] (!%p138_p2)   ;;  %v1086_v7 = vld [vmem:[%s1421_s1 + $0x68] ss:$8 sps:$4 sm:$0xff] (!%p138_p2)   ;;  %v1088_v9 = vld [vmem:[%s1421_s1 + $0x7c] ss:$8 sps:$4 sm:$0xff] (!%p138_p2)  }
   0x8   : > { %277 = vmatpush1.bf16.msra.mxu1 (!%p138_p2), %v1080_v3  ;;  %511 = vmatpush1.bf16.msra.mxu0 (!%p138_p2), %v1081_v4  ;;  %v1084_v6 = vld [vmem:[%s1421_s1 + $0xc4] ss:$8 sps:$4 sm:$0xff] (!%p138_p2)   ;;  %v1087_v8 = vld [vmem:[%s1421_s1 + $0xc0] ss:$8 sps:$4 sm:$0xff] (!%p138_p2)   ;;  %v1090_v10 = vld [vmem:[%s1421_s1 + $0xd4] ss:$8 sps:$4 sm:$0xff] (!%p138_p2)  }
   0x9   : > { %278 = vmatprep.subr.bf16.mxu1 (!%p138_p2), %v1082_v5  ;;  %512 = vmatprep.subr.bf16.mxu0 (!%p138_p2), %v1084_v6  ;;  %v1092_v11 = vld [vmem:[%s1421_s1 + $0x78] ss:$8 sps:$4 sm:$0xff] (!%p138_p2)   ;;  %v1094_v13 = vld [vmem:[%s1421_s1 + $0x8c] ss:$8 sps:$4 sm:$0xff] (!%p138_p2)   ;;  %v1098_v15 = vld [vmem:[%s1421_s1 + $0x88] ss:$8 sps:$4 sm:$0xff] (!%p138_p2)  }
   0xa   : > { %v1093_v12 = vld [vmem:[%s1421_s1 + $0xd0] ss:$8 sps:$4 sm:$0xff] (!%p138_p2)   ;;  %v1096_v14 = vld [vmem:[%s1421_s1 + $0xe4] ss:$8 sps:$4 sm:$0xff] (!%p138_p2)   ;;  %v1099_v16 = vld [vmem:[%s1421_s1 + $0xe0] ss:$8 sps:$4 sm:$0xff] (!%p138_p2)  }
   0xb   : > { %v1100_v17 = vld [vmem:[%s1421_s1 + $0x9c] ss:$8 sps:$4 sm:$0xff] (!%p138_p2)   ;;  %v934_v19 = vld [vmem:[%s1421_s1 + $0xa8] sm:$0x33] (!%p138_p2)  ;;  %v1104_v21 = vld [vmem:[%s1421_s1 + $0x98] ss:$8 sps:$4 sm:$0xff] (!%p138_p2)  }
   0xc   : > { %279 = vmatpush1.bf16.msra.mxu1 (!%p138_p2), %v1086_v7  ;;  %513 = vmatpush1.bf16.msra.mxu0 (!%p138_p2), %v1087_v8  ;;  %v1102_v18 = vld [vmem:[%s1421_s1 + $0xf4] ss:$8 sps:$4 sm:$0xff] (!%p138_p2)   ;;  %v975_v20 = vld [vmem:[%s1421_s1 + $0x100] sm:$0x33] (!%p138_p2)  ;;  %v1105_v22 = vld [vmem:[%s1421_s1 + $0xf0] ss:$8 sps:$4 sm:$0xff] (!%p138_p2)   ;;  %v947_v23 = vcombine.high (!%p138_p2), %v934_v19, %v934_v19  ;;  %v946_v25 = vcombine.low (!%p138_p2), %v934_v19, %v934_v19 }
   0xd   : > { %s1425_s13 = smov (!%p161_p3, %s915_s13), 1  ;;  %280 = vmatprep.subr.bf16.mxu1 %v1088_v9  ;;  %514 = vmatprep.subr.bf16.mxu0 %v1090_v10  ;;  %v988_v24 = vcombine.high %v975_v20, %v975_v20  ;;  %v987_v26 = vcombine.low %v975_v20, %v975_v20  ;;  %v1112_v36 = vld [vmem:[%s1421_s1 + $0x4] ss:$8 sps:$4 sm:$0xff]   ;;  %v1110_v39 = vld [vmem:[%s1421_s1] ss:$8 sps:$4 sm:$0xff]   ;;  %vm265_vm1 = vcmask 687104  }
   0xe   : > { %s1047_s17 = sshll.u32 %s1425_s13, 3  ;;  %v271_v34 = vsel %vm269_vm0, %v946_v25, 0  ;;  %v1115_v37 = vld [vmem:[%s1421_s1 + $0x10c] ss:$8 sps:$4 sm:$0xff]   ;;  %v1113_v41 = vld [vmem:[%s1421_s1 + $0x108] ss:$8 sps:$4 sm:$0xff]  }
   0xf   : > { %s1271_s5 = scalar_lea.vmem %s1420_s0, %s1047_s17  ;;  %v505_v35 = vsel %vm269_vm0, %v987_v26, 0  ;;  %v1122_v43 = vld [vmem:[%s1421_s1 + $0x14] ss:$8 sps:$4 sm:$0xff]   ;;  %v1120_v45 = vld [vmem:[%s1421_s1 + $0x10] ss:$8 sps:$4 sm:$0xff]   ;;  %s1048_s4 = sshll.u32 %s1425_s13, 4 }
  0x10   : > { %281 = vmatpush1.bf16.msra.mxu1 %v1092_v11  ;;  %515 = vmatpush1.bf16.msra.mxu0 %v1093_v12  ;;  %v1280_v27 = vld [vmem:[%s1271_s5] sm:$0xf]  ;;  %v185_v28 = vld [vmem:[%s1271_s5 + $0x4] sm:$0x3]  ;;  %v1131_v48 = vld [vmem:[%s1421_s1 + $0x12c] ss:$8 sps:$4 sm:$0xff]   ;;  %s170_s8 = scalar_lea.vmem %s1423_s3, %s1048_s4 }
  0x11   : > { %282 = vmatprep.subr.bf16.mxu1 %v1094_v13  ;;  %516 = vmatprep.subr.bf16.mxu0 %v1096_v14  ;;  %v429_v29 = vld [vmem:[%s1271_s5] sm:$0xe]  ;;  %v935_v30 = vcombine.low %v1280_v27, %v185_v28  ;;  %v1125_v44 = vld [vmem:[%s1421_s1 + $0x11c] ss:$8 sps:$4 sm:$0xff]   ;;  %v1129_v51 = vld [vmem:[%s1421_s1 + $0x128] ss:$8 sps:$4 sm:$0xff]  }
  0x12   : > { %v976_v31 = vcombine.low %v429_v29, %v185_v28  ;;  %v1123_v46 = vld [vmem:[%s1421_s1 + $0x118] ss:$8 sps:$4 sm:$0xff]   ;;  %v1128_v47 = vld [vmem:[%s1421_s1 + $0x24] ss:$8 sps:$4 sm:$0xff]   ;;  %v1134_v52 = vld [vmem:[%s1421_s1 + $0x34] ss:$8 sps:$4 sm:$0xff]  }
  0x13   : > { %v204_v32 = vshrl.u32 %v935_v30, 16  ;;  %v206_v33 = vshll.u32 %v935_v30, 16  ;;  %v1322_v49 = vld [vmem:[%s1271_s5 + $0x4] sm:$0x7]  ;;  %v1126_v50 = vld [vmem:[%s1421_s1 + $0x20] ss:$8 sps:$4 sm:$0xff]  }
  0x14   : > { %283 = vmatpush1.bf16.msra.mxu1 %v1098_v15  ;;  %517 = vmatpush1.bf16.msra.mxu0 %v1099_v16  ;;  %v445_v40 = vrot.slane %v976_v31, 1  ;;  %v1137_v53 = vld [vmem:[%s1421_s1 + $0x13c] ss:$8 sps:$4 sm:$0xff]   ;;  %v1002_v54 = vcombine.low %v429_v29, %v1322_v49  ;;  %v1132_v55 = vld [vmem:[%s1421_s1 + $0x30] ss:$8 sps:$4 sm:$0xff]   ;;  %vm852_vm2 = vcmask 1043456  }
  0x15   : > { %284 = vmatprep.subr.bf16.mxu1 %v1100_v17  ;;  %518 = vmatprep.subr.bf16.mxu0 %v1102_v18  ;;  %v208_v38 = vrot.slane %v206_v33, 1  ;;  %v1135_v56 = vld [vmem:[%s1421_s1 + $0x138] ss:$8 sps:$4 sm:$0xff]   ;;  %v1140_v57 = vld [vmem:[%s1421_s1 + $0x44] ss:$8 sps:$4 sm:$0xff]   ;;  %v822_v33 = vlaneseq  ;;  %vm853_vm3 = vcmask 261124  }
  0x16   : > { %v1143_v58 = vld [vmem:[%s1421_s1 + $0x14c] ss:$8 sps:$4 sm:$0xff]   ;;  %v1001_v60 = vld [vmem:[%s1421_s1 + $0x158] sm:$0x33]  ;;  %v574_v61 = vshrl.u32 %v1002_v54, 16  ;;  %v577_v62 = vshll.u32 %v1002_v54, 16  ;;  %vm854_vm6 = vmor %vm853_vm3, %vm852_vm2 }
  0x17   : > { %v209_v42 = vor.u32 %v208_v38, %v204_v32  ;;  %v184_v59 = vld [vmem:[%s1421_s1 + $0x50] sm:$0x33]  ;;  %v1138_v63 = vld [vmem:[%s1421_s1 + $0x40] ss:$8 sps:$4 sm:$0xff]   ;;  %v1014_v3 = vcombine.high %v1001_v60, %v1001_v60  ;;  %v1013_v5 = vcombine.low %v1001_v60, %v1001_v60  ;;  %v173_v8 = vld [vmem:[%s1271_s5 + $0x4] sm:$0x1] }
  0x18   : > { %285 = vmatpush1.bf16.msra.mxu1 %v1104_v21  ;;  %519 = vmatpush1.bf16.msra.mxu0 %v1105_v22  ;;  %v1141_v0 = vld [vmem:[%s1421_s1 + $0x148] ss:$8 sps:$4 sm:$0xff]   ;;  %v962_v1 = vcombine.high %v184_v59, %v184_v59  ;;  %v961_v4 = vcombine.low %v184_v59, %v184_v59  ;;  %v576_v6 = vrot.slane %v574_v61, 1  ;;  %v579_v7 = vrot.slane %v577_v62, 2  ;;  %v1151_v11 = vld [vmem:[%s1421_s1 + $0x164] ss:$8 sps:$4 sm:$0xff]  }
  0x19   : > { %948 = vmatprep.subr.msk.bf16.mxu1 %vm269_vm0, %v947_v23  ;;  %989 = vmatprep.subr.msk.bf16.mxu0 %vm269_vm0, %v988_v24  ;;  %v640_v10 = vsel %vm269_vm0, %v1013_v5, 0  ;;  %v950_v12 = vcombine.low %v1280_v27, %v173_v8  ;;  %v1149_v14 = vld [vmem:[%s1421_s1 + $0x160] ss:$8 sps:$4 sm:$0xff]   ;;  %v1154_v15 = vld [vmem:[%s1421_s1 + $0x174] ss:$8 sps:$4 sm:$0xff]   ;;  %vm856_vm4 = vcmask 1040384  }
  0x1a   : > { %v381_v9 = vsel %vm269_vm0, %v961_v4, 0  ;;  %v580_v13 = vor.u32 %v579_v7, %v576_v6  ;;  %v1152_v16 = vld [vmem:[%s1421_s1 + $0x170] ss:$8 sps:$4 sm:$0xff]   ;;  %v1157_v17 = vld [vmem:[%s1421_s1 + $0x184] ss:$8 sps:$4 sm:$0xff]   ;;  %vm857_vm5 = vcmask 258052  }
  0x1b   : > { %v1155_v18 = vld [vmem:[%s1421_s1 + $0x180] ss:$8 sps:$4 sm:$0xff]   ;;  %v1160_v19 = vld [vmem:[%s1421_s1 + $0x194] ss:$8 sps:$4 sm:$0xff]   ;;  %v1163_v20 = vld [vmem:[%s1421_s1 + $0x1a4] ss:$8 sps:$4 sm:$0xff]  }
  0x1c   : > { %287 = vmatpush1.bf16.msra.mxu1 %v271_v34  ;;  %521 = vmatpush1.bf16.msra.mxu0 %v505_v35  ;;  %v1027_v21 = vld [vmem:[%s1421_s1 + $0x1b0] sm:$0x33]  ;;  %v692_v22 = vld [vmem:[%s1271_s5] sm:$0xc]  ;;  %v823_v34 = vshrl.u32 %v822_v33, 7  ;;  %vm858_vm7 = vmor %vm857_vm5, %vm856_vm4 }
  0x1d   : > { %386 = vmatprep.subr.bf16.mxu1 %v1112_v36  ;;  %645 = vmatprep.subr.bf16.mxu0 %v1115_v37  ;;  %v1161_v23 = vld [vmem:[%s1421_s1 + $0x1a0] ss:$8 sps:$4 sm:$0xff]   ;;  %v1040_v24 = vcombine.high %v1027_v21, %v1027_v21  ;;  %v1039_v25 = vcombine.low %v1027_v21, %v1027_v21  ;;  %v1028_v26 = vcombine.low %v692_v22, %v1322_v49 }
  0x1e   : > { %v824_v35 = vsub.s32 0, %v823_v34  ;;  %v820_v36 = vld [vmem:[%s1422_s2] sm:$0x3]  ;;  %v828_v37 = vsub.s32 1, %v823_v34 }
  0x1f   : > { %949 = vmatmul.mubr.msk.bf16.vlgmr.msra.gmra.mrb[0].mxu1 %vm265_vm1, %v209_v42  ;;  %990 = vmatmul.mubr.msk.bf16.vlgmr.msra.gmra.mrb[0].mxu0 %vm265_vm1, %v445_v40  ;;  %v768_v27 = vsel %vm269_vm0, %v1039_v25, 0  ;;  %v708_v28 = vrot.slane %v1028_v26, 2 }
  0x20   : > { %387 = vmatpush1.bf16.msra.mxu1 %v1110_v39  ;;  %646 = vmatpush1.bf16.msra.mxu0 %v1113_v41  ;;  %v825_v38 = vrot.slane %v820_v36, %v824_v35  ;;  %v829_v40 = vrot.slane %v820_v36, %v828_v37 }
  0x21   : > { %388 = vmatprep.subr.bf16.mxu1 %v1122_v43  ;;  %647 = vmatprep.subr.bf16.mxu0 %v1125_v44 }
  0x22   : > { %418 = vmatprep.mubr.bf16.mxu1 %v1174_v2  ;;  %677 = vmatprep.mubr.bf16.mxu0 %v1174_v2 }
  0x24   : > { %389 = vmatpush1.bf16.msra.mxu1 %v1120_v45  ;;  %648 = vmatpush1.bf16.msra.mxu0 %v1123_v46 }
  0x25   : > { %390 = vmatprep.subr.bf16.mxu1 %v1128_v47  ;;  %649 = vmatprep.subr.bf16.mxu0 %v1131_v48 }
  0x28   : > { %391 = vmatpush1.bf16.msra.mxu1 %v1126_v50  ;;  %650 = vmatpush1.bf16.msra.mxu0 %v1129_v51 }
  0x29   : > { %392 = vmatprep.subr.bf16.mxu1 %v1134_v52  ;;  %651 = vmatprep.subr.bf16.mxu0 %v1137_v53 }
  0x2c   : > { %393 = vmatpush1.bf16.msra.mxu1 %v1132_v55  ;;  %652 = vmatpush1.bf16.msra.mxu0 %v1135_v56 }
  0x2d   : > { %394 = vmatprep.subr.bf16.mxu1 %v1140_v57  ;;  %653 = vmatprep.subr.bf16.mxu0 %v1143_v58 }
  0x30   : > { %395 = vmatpush1.bf16.msra.mxu1 %v1138_v63  ;;  %654 = vmatpush1.bf16.msra.mxu0 %v1141_v0 }
  0x31   : > { %963 = vmatprep.subr.msk.bf16.mxu1 %vm269_vm0, %v962_v1  ;;  %1015 = vmatprep.subr.msk.bf16.mxu0 %vm269_vm0, %v1014_v3 }
  0x34   : > { %397 = vmatpush1.bf16.msra.mxu1 %v381_v9  ;;  %656 = vmatpush1.bf16.msra.mxu0 %v640_v10 }
  0x35   : > { %773 = vmatprep.subr.bf16.mxu0 %v1151_v11 }
  0x37   : > { %964 = vmatmul.mubr.msk.bf16.vlgmr.msra.gmra.mrb[0].mxu1 %vm265_vm1, %v950_v12  ;;  %1016 = vmatmul.mubr.msk.bf16.vlgmr.msra.gmra.mrb[0].mxu0 %vm265_vm1, %v580_v13 }
  0x38   : > { %774 = vmatpush1.bf16.msra.mxu0 %v1149_v14  ;;  %805 = vmatprep.mubr.bf16.mxu0 %v1174_v2  ;;  %v1158_v2 = vld [vmem:[%s1421_s1 + $0x190] ss:$8 sps:$4 sm:$0xff]  }
  0x39   : > { %775 = vmatprep.subr.bf16.mxu0 %v1154_v15 }
  0x3c   : > { %776 = vmatpush1.bf16.msra.mxu0 %v1152_v16 }
  0x3d   : > { %777 = vmatprep.subr.bf16.mxu0 %v1157_v17 }
  0x40   : > { %778 = vmatpush1.bf16.msra.mxu0 %v1155_v18 }
  0x41   : > { %779 = vmatprep.subr.bf16.mxu0 %v1160_v19 }
  0x44   : > { %780 = vmatpush1.bf16.msra.mxu0 %v1158_v2 }
  0x45   : > { %781 = vmatprep.subr.bf16.mxu0 %v1163_v20 }
  0x48   : > { %782 = vmatpush1.bf16.msra.mxu0 %v1161_v23 }
  0x49   : > { %1041 = vmatprep.subr.msk.bf16.mxu0 %vm269_vm0, %v1040_v24 }
  0x4c   : > { %784 = vmatpush1.bf16.msra.mxu0 %v768_v27 }
  0x4f   : > { %1042 = vmatmul.mubr.msk.bf16.vlgmr.msra.gmra.mrb[0].mxu0 %vm265_vm1, %v708_v28 }
 0x10a   : > { %v420_v29 = vpop.f32.mrb[0].mxu1 }
 0x10b   : > { %v422_v30 = vpop.f32.mrb[1].mxu1 }
 0x10c   : > { %v424_v31 = vpop.f32.mrb[2].mxu1 }
 0x10d   : > { %v426_v32 = vpop.f32.mrb[3].mxu1 }
 0x122   : > { %v807_v39 = vpop.f32.mrb[0].mxu0 }
 0x123   : > { %v1051_v41 = vadd.f32 %v807_v39, %v420_v29  ;;  %v809_v42 = vpop.f32.mrb[1].mxu0 }
 0x124   : > { %v1052_v43 = vadd.f32 %v809_v42, %v422_v30  ;;  %v811_v44 = vpop.f32.mrb[2].mxu0 }
 0x125   : > { %v832_v45 = vadd.f32 %v1051_v41, %v825_v38  ;;  %v1053_v46 = vadd.f32 %v811_v44, %v424_v31  ;;  %v813_v47 = vpop.f32.mrb[3].mxu0 }
 0x126   : > { %v833_v48 = vadd.f32 %v1052_v43, %v829_v40  ;;  %v1054_v49 = vadd.f32 %v813_v47, %v426_v32 }
 0x127   : > { %v836_v50 = vmax.f32 %v832_v45, 0.0  ;;  %v834_v51 = vadd.f32 %v1053_v46, %v825_v38 }
 0x128   : > { %v837_v52 = vmax.f32 %v833_v48, 0.0  ;;  %v835_v53 = vadd.f32 %v1054_v49, %v829_v40 }
 0x129   : > { %v838_v54 = vmax.f32 %v834_v51, 0.0 }
 0x12a   : > { %v1049_v55 = vpack.c.bf16 %v837_v52, %v836_v50  ;;  %v839_v56 = vmax.f32 %v835_v53, 0.0 }
 0x12c   : > { %855 = vst.msk [vmem:[%s170_s8] sm:$0xff] %vm854_vm6, %v1049_v55  ;;  %v1050_v57 = vpack.c.bf16 %v839_v56, %v838_v54 }
 0x12e   : > { %859 = vst.msk [vmem:[%s170_s8 + $0x8] sm:$0x11] %vm858_vm7, %v1050_v57 }
 0x12f PF: > { %s13_s12 = sadd.s32 1, %s1172_s12  }
 0x130   : > { %p10_p4 = scmp.ge.s32.totalorder %s13_s12, 4  }
 0x132   :  { %12 = sbr.rel (!%p10_p4) target bundleno = 1 (0x1), region = 66 }

// kernel: lenet_forward.5
= control target key start
LH: loop header
LB: loop body
LE: loop exit
PB: predicated region body
PF: predicated region fallthrough
CT: control target
= control target key end

     0   :  { %s1227_s24 = smov 0   ;;  %s1421_s0 = inlined_call_operand.vmem [shape: bf16[32,512], index: 0, kind: input, shape index: {}]   ;;  %s1422_s1 = inlined_call_operand.vmem [shape: bf16[512,128], index: 1, kind: input, shape index: {}]   ;;  %s1423_s2 = inlined_call_operand.vmem [shape: f32[1,128], index: 2, kind: input, shape index: {}]   ;;  %s1424_s3 = inlined_call_operand.vmem [shape: bf16[128,128], index: 3, kind: input, shape index: {}]   ;;  %s1425_s4 = inlined_call_operand.vmem [shape: f32[1,128], index: 4, kind: input, shape index: {}]   ;;  %s1426_s5 = inlined_call_operand.vmem [shape: bf16[128,128], index: 5, kind: input, shape index: {}]   ;;  %s1427_s6 = inlined_call_operand.vmem [shape: f32[1,128], index: 6, kind: input, shape index: {}]   ;;  %s1428_s7 = inlined_call_operand.vmem [shape: f32[32,128], index: 7, kind: output, shape index: {}]  }
   0x1 LB: > { %s943_s25 = sadd.s32 4294967295, %s1183_s24   ;;  %p947_p0 = scmp.ge.s32.totalorder %s1183_s24, 1  ;;  %s1183_s24 = sphi %s1227_s24, %s17_s24  }
   0x2   : > { %p239_p1 = scmp.lt.s32.totalorder %s1183_s24, 3 }
   0x4   : > { %p240_p2 = pnand %p947_p0, %p239_p1 }
   0x5   : > { %v1123_v0 = vld [vmem:[%s1422_s1 + $0x40] sm:$0xff] (!%p240_p2)   ;;  %v1127_v4 = vld [vmem:[%s1422_s1 + $0x48] sm:$0xff] (!%p240_p2)   ;;  %v1131_v8 = vld [vmem:[%s1422_s1 + $0x50] sm:$0xff] (!%p240_p2)   ;;  %s948_s14 = sshll.u32 (!%p240_p2), %s943_s25, 1  ;;  %v1185_v34 = vmov (!%p240_p2), 0.0   ;;  %vm1186_vm0 = vmmov (!%p240_p2), 0  }
   0x6   : > { %243 = sbr.rel (%p240_p2) target bundleno = 701 (0x2bd), region = 48  ;;  %v1124_v1 = vld [vmem:[%s1422_s1 + $0xc0] sm:$0xff] (!%p240_p2)   ;;  %1011 = vmatprep.subr.bf16.mxu0 (!%p240_p2), %v1123_v0  ;;  %v1128_v5 = vld [vmem:[%s1422_s1 + $0xc8] sm:$0xff] (!%p240_p2)   ;;  %v1132_v9 = vld [vmem:[%s1422_s1 + $0xd0] sm:$0xff] (!%p240_p2)   ;;  %p273_p3 = scmp.lt.s32.totalorder (!%p240_p2), %s948_s14, 3 }
   0x7   : > { %v1125_v2 = vld [vmem:[%s1422_s1] sm:$0xff] (!%p240_p2)   ;;  %1033 = vmatprep.subr.bf16.mxu1 (!%p240_p2), %v1124_v1  ;;  %v1129_v6 = vld [vmem:[%s1422_s1 + $0x8] sm:$0xff] (!%p240_p2)   ;;  %v1133_v10 = vld [vmem:[%s1422_s1 + $0x10] sm:$0xff] (!%p240_p2)  }
   0x8   : > { %v1126_v3 = vld [vmem:[%s1422_s1 + $0x80] sm:$0xff] (!%p240_p2)   ;;  %1012 = vmatpush3.bf16.msra.mxu0 (!%p240_p2), %v1125_v2  ;;  %v1130_v7 = vld [vmem:[%s1422_s1 + $0x88] sm:$0xff] (!%p240_p2)   ;;  %v1134_v11 = vld [vmem:[%s1422_s1 + $0x90] sm:$0xff] (!%p240_p2)  }
   0x9   : > { %1034 = vmatpush3.bf16.msra.mxu1 (!%p240_p2), %v1126_v3  ;;  %1013 = vmatprep.subr.bf16.mxu0 (!%p240_p2), %v1127_v4  ;;  %v1135_v12 = vld [vmem:[%s1422_s1 + $0x58] sm:$0xff] (!%p240_p2)   ;;  %v1139_v16 = vld [vmem:[%s1422_s1 + $0x60] sm:$0xff] (!%p240_p2)   ;;  %v1143_v20 = vld [vmem:[%s1422_s1 + $0x68] sm:$0xff] (!%p240_p2)  }
   0xa   : > { %1035 = vmatprep.subr.bf16.mxu1 (!%p240_p2), %v1128_v5  ;;  %v1136_v13 = vld [vmem:[%s1422_s1 + $0xd8] sm:$0xff] (!%p240_p2)   ;;  %v1140_v17 = vld [vmem:[%s1422_s1 + $0xe0] sm:$0xff] (!%p240_p2)   ;;  %v1144_v21 = vld [vmem:[%s1422_s1 + $0xe8] sm:$0xff] (!%p240_p2)  }
   0xb   : > { %v1137_v14 = vld [vmem:[%s1422_s1 + $0x18] sm:$0xff] (!%p240_p2)   ;;  %v1141_v18 = vld [vmem:[%s1422_s1 + $0x20] sm:$0xff] (!%p240_p2)   ;;  %v1145_v22 = vld [vmem:[%s1422_s1 + $0x28] sm:$0xff] (!%p240_p2)  }
   0xc   : > { %1014 = vmatpush3.bf16.msra.mxu0 (!%p240_p2), %v1129_v6  ;;  %v1138_v15 = vld [vmem:[%s1422_s1 + $0x98] sm:$0xff] (!%p240_p2)   ;;  %v1142_v19 = vld [vmem:[%s1422_s1 + $0xa0] sm:$0xff] (!%p240_p2)   ;;  %v1146_v23 = vld [vmem:[%s1422_s1 + $0xa8] sm:$0xff] (!%p240_p2)  }
   0xd   : > { %1036 = vmatpush3.bf16.msra.mxu1 %v1130_v7  ;;  %1015 = vmatprep.subr.bf16.mxu0 %v1131_v8  ;;  %s1430_s14 = smov (!%p273_p3, %s948_s14), 3  ;;  %v1147_v24 = vld [vmem:[%s1422_s1 + $0x70] sm:$0xff]   ;;  %v1151_v28 = vld [vmem:[%s1422_s1 + $0x78] sm:$0xff]   ;;  %v1161_v37 = vld [vmem:[%s1424_s3] sm:$0xff]  }
   0xe   : > { %1037 = vmatprep.subr.bf16.mxu1 %v1132_v9  ;;  %v1148_v25 = vld [vmem:[%s1422_s1 + $0xf0] sm:$0xff]   ;;  %s1010_s16 = sshll.u32 %s1430_s14, 4  ;;  %v1152_v29 = vld [vmem:[%s1422_s1 + $0xf8] sm:$0xff]   ;;  %v1162_v38 = vld [vmem:[%s1424_s3 + $0x8] sm:$0xff]   ;;  %s952_s23 = sshll.u32 %s1430_s14, 3 }
   0xf   : > { %v1149_v26 = vld [vmem:[%s1422_s1 + $0x30] sm:$0xff]   ;;  %s277_s26 = scalar_lea.vmem %s1421_s0, %s1010_s16  ;;  %v1153_v30 = vld [vmem:[%s1422_s1 + $0x38] sm:$0xff]   ;;  %v1165_v41 = vld [vmem:[%s1424_s3 + $0x20] sm:$0xff]   ;;  %s283_s30 = scalar_lea.vmem %s1428_s7, %s952_s23 }
  0x10   : > { %1016 = vmatpush3.bf16.msra.mxu0 %v1133_v10  ;;  %v1150_v27 = vld [vmem:[%s1422_s1 + $0xb0] sm:$0xff]   ;;  %v1154_v31 = vld [vmem:[%s1422_s1 + $0xb8] sm:$0xff]   ;;  %v1166_v42 = vld [vmem:[%s1424_s3 + $0x28] sm:$0xff]  }
  0x11   : > { %1038 = vmatpush3.bf16.msra.mxu1 %v1134_v11  ;;  %1017 = vmatprep.subr.bf16.mxu0 %v1135_v12  ;;  %v1155_v32 = vld [vmem:[%s277_s26] ss:$16 sps:$4 sm:$0xff]   ;;  %v1157_v33 = vld [vmem:[%s277_s26 + $0x4] ss:$16 sps:$4 sm:$0xff]   ;;  %v1158_v35 = vld [vmem:[%s277_s26 + $0x8] ss:$16 sps:$4 sm:$0xff]  }
  0x12   : > { %1039 = vmatprep.subr.bf16.mxu1 %v1136_v13  ;;  %v1160_v36 = vld [vmem:[%s277_s26 + $0xc] ss:$16 sps:$4 sm:$0xff]   ;;  %605 = vmatprep.mubr.bf16.mxu0 %v1157_v33  ;;  %v1163_v39 = vld [vmem:[%s1424_s3 + $0x10] sm:$0xff]   ;;  %v1169_v45 = vld [vmem:[%s1426_s5] sm:$0xff]  }
  0x13   : > { %646 = vmatprep.mubr.bf16.mxu1 %v1160_v36  ;;  %v1164_v40 = vld [vmem:[%s1424_s3 + $0x18] sm:$0xff]   ;;  %v1167_v43 = vld [vmem:[%s1424_s3 + $0x30] sm:$0xff]   ;;  %v1170_v46 = vld [vmem:[%s1426_s5 + $0x8] sm:$0xff]  }
  0x14   : > { %1018 = vmatpush3.bf16.msra.mxu0 %v1137_v14  ;;  %v1168_v44 = vld [vmem:[%s1424_s3 + $0x38] sm:$0xff]   ;;  %v1171_v47 = vld [vmem:[%s1426_s5 + $0x10] sm:$0xff]   ;;  %v1173_v49 = vld [vmem:[%s1426_s5 + $0x20] sm:$0xff]  }
  0x15   : > { %1040 = vmatpush3.bf16.msra.mxu1 %v1138_v15  ;;  %1019 = vmatprep.subr.bf16.mxu0 %v1139_v16  ;;  %v1172_v48 = vld [vmem:[%s1426_s5 + $0x18] sm:$0xff]   ;;  %v1174_v50 = vld [vmem:[%s1426_s5 + $0x28] sm:$0xff]   ;;  %v953_v53 = vld [vmem:[%s1423_s2] ss:$0 sm:$0xff] }
  0x16   : > { %1041 = vmatprep.subr.bf16.mxu1 %v1140_v17  ;;  %v1175_v7 = vld [vmem:[%s1426_s5 + $0x30] sm:$0xff]   ;;  %v1176_v8 = vld [vmem:[%s1426_s5 + $0x38] sm:$0xff]   ;;  %v990_v9 = vld [vmem:[%s1425_s4] ss:$0 sm:$0xff] }
  0x18   : > { %1020 = vmatpush3.bf16.msra.mxu0 %v1141_v18 }
  0x19   : > { %1042 = vmatpush3.bf16.msra.mxu1 %v1142_v19  ;;  %1021 = vmatprep.subr.bf16.mxu0 %v1143_v20  ;;  %v999_v19 = vld [vmem:[%s1427_s6] ss:$0 sm:$0xff] }
  0x1a   : > { %1043 = vmatprep.subr.bf16.mxu1 %v1144_v21 }
  0x1c   : > { %1022 = vmatpush3.bf16.msra.mxu0 %v1145_v22 }
  0x1d   : > { %1044 = vmatpush3.bf16.msra.mxu1 %v1146_v23  ;;  %1023 = vmatprep.subr.bf16.mxu0 %v1147_v24 }
  0x1e   : > { %1045 = vmatprep.subr.bf16.mxu1 %v1148_v25 }
  0x20   : > { %1024 = vmatpush3.bf16.msra.mxu0 %v1149_v26 }
  0x21   : > { %1046 = vmatpush3.bf16.msra.mxu1 %v1150_v27  ;;  %1025 = vmatprep.subr.bf16.mxu0 %v1151_v28 }
  0x22   : > { %1047 = vmatprep.subr.bf16.mxu1 %v1152_v29 }
  0x24   : > { %1026 = vmatpush3.bf16.msra.mxu0 %v1153_v30 }
  0x25   : > { %1048 = vmatpush3.bf16.msra.mxu1 %v1154_v31  ;;  %1073 = vmatprep.subr.bf16.mxu0 %v1185_v34 }
  0x26   : > { %1093 = vmatprep.subr.bf16.mxu1 %v1185_v34 }
  0x27   : > { %606 = vmatmul.mubr.bf16.vlgmr.msra.gmra.mrb[0].mxu0 %v1155_v32 }
  0x28   : > { %647 = vmatmul.mubr.bf16.vlgmr.msra.gmra.mrb[0].mxu1 %v1158_v35  ;;  %1074 = vmatpush3.bf16.msra.mxu0 %v1161_v37 }
  0x29   : > { %1075 = vmatprep.subr.bf16.mxu0 %v1185_v34  ;;  %1089 = vmatprep.mubr.msk.bf16.mxu0 %vm1186_vm0, %v1185_v34 }
  0x2a   : > { %1109 = vmatprep.mubr.msk.bf16.mxu1 %vm1186_vm0, %v1185_v34  ;;  %1094 = vmatpush3.bf16.msra.mxu1 %v1169_v45 }
  0x2b   : > { %1095 = vmatprep.subr.bf16.mxu1 %v1185_v34 }
  0x2c   : > { %1076 = vmatpush3.bf16.msra.mxu0 %v1162_v38 }
  0x2d   : > { %1077 = vmatprep.subr.bf16.mxu0 %v1185_v34 }
  0x2e   : > { %1096 = vmatpush3.bf16.msra.mxu1 %v1170_v46 }
  0x2f   : > { %1097 = vmatprep.subr.bf16.mxu1 %v1185_v34 }
  0x30   : > { %1078 = vmatpush3.bf16.msra.mxu0 %v1163_v39 }
  0x31   : > { %1079 = vmatprep.subr.bf16.mxu0 %v1185_v34 }
  0x32   : > { %1098 = vmatpush3.bf16.msra.mxu1 %v1171_v47 }
  0x33   : > { %1099 = vmatprep.subr.bf16.mxu1 %v1185_v34 }
  0x34   : > { %1080 = vmatpush3.bf16.msra.mxu0 %v1164_v40 }
  0x35   : > { %1081 = vmatprep.subr.bf16.mxu0 %v1185_v34 }
  0x36   : > { %1100 = vmatpush3.bf16.msra.mxu1 %v1172_v48 }
  0x37   : > { %1101 = vmatprep.subr.bf16.mxu1 %v1185_v34 }
  0x38   : > { %1082 = vmatpush3.bf16.msra.mxu0 %v1165_v41 }
  0x39   : > { %1083 = vmatprep.subr.bf16.mxu0 %v1185_v34 }
  0x3a   : > { %1102 = vmatpush3.bf16.msra.mxu1 %v1173_v49 }
  0x3b   : > { %1103 = vmatprep.subr.bf16.mxu1 %v1185_v34 }
  0x3c   : > { %1084 = vmatpush3.bf16.msra.mxu0 %v1166_v42 }
  0x3d   : > { %1085 = vmatprep.subr.bf16.mxu0 %v1185_v34 }
  0x3e   : > { %1104 = vmatpush3.bf16.msra.mxu1 %v1174_v50 }
  0x3f   : > { %1105 = vmatprep.subr.bf16.mxu1 %v1185_v34 }
  0x40   : > { %1086 = vmatpush3.bf16.msra.mxu0 %v1167_v43 }
  0x41   : > { %1087 = vmatprep.subr.bf16.mxu0 %v1185_v34 }
  0x42   : > { %1106 = vmatpush3.bf16.msra.mxu1 %v1175_v7 }
  0x43   : > { %1107 = vmatprep.subr.bf16.mxu1 %v1185_v34 }
  0x44   : > { %1088 = vmatpush3.bf16.msra.mxu0 %v1168_v44 }
  0x46   : > { %1108 = vmatpush3.bf16.msra.mxu1 %v1176_v8 }
  0xfa   : > { %v1027_v51 = vpop.f32.mrb[0].mxu0 }
  0xfb   : > { %v1049_v52 = vpop.f32.mrb[0].mxu1  ;;  %v1028_v54 = vpop.f32.mrb[1].mxu0 }
  0xfc   : > { %v1029_v55 = vadd.f32 %v1028_v54, %v1027_v51  ;;  %v1050_v56 = vpop.f32.mrb[1].mxu1  ;;  %v1030_v57 = vpop.f32.mrb[2].mxu0 }
  0xfd   : > { %v1051_v58 = vadd.f32 %v1050_v56, %v1049_v52  ;;  %v1052_v59 = vpop.f32.mrb[2].mxu1  ;;  %v1031_v60 = vpop.f32.mrb[3].mxu0 }
  0xfe   : > { %v608_v61 = vadd.f32 %v1029_v55, %v953_v53  ;;  %v1032_v62 = vadd.f32 %v1031_v60, %v1030_v57  ;;  %v1053_v63 = vpop.f32.mrb[3].mxu1 }
  0xff   : > { %v1054_v0 = vadd.f32 %v1053_v63, %v1052_v59 }
 0x100   : > { %v649_v1 = vadd.f32 %v1051_v58, %v608_v61  ;;  %v611_v2 = vadd.f32 %v1032_v62, %v953_v53 }
 0x102   : > { %v652_v3 = vadd.f32 %v1054_v0, %v611_v2  ;;  %v655_v4 = vmax.f32 %v649_v1, 0.0 }
 0x104   : > { %v656_v5 = vmax.f32 %v652_v3, 0.0 }
 0x106   : > { %v657_v6 = vpack.c.bf16 %v656_v5, %v655_v4 }
 0x108   : > { %1090 = vmatmul.mubr.bf16.vlgmr.msra.gmra.mrb[4].mxu0 %v657_v6 }
 0x1db   : > { %v763_v10 = vpop.f32.mrb[4].mxu0 }
 0x1dc   : > { %v764_v11 = vadd.f32 %v990_v9, %v763_v10  ;;  %v1091_v12 = vpop.f32.mrb[5].mxu0 }
 0x1dd   : > { %v766_v13 = vpop.f32.mrb[6].mxu0 }
 0x1de   : > { %v767_v14 = vadd.f32 %v990_v9, %v766_v13  ;;  %v1092_v15 = vpop.f32.mrb[7].mxu0  ;;  %v770_v16 = vmax.f32 %v764_v11, 0.0 }
 0x1e0   : > { %v771_v17 = vmax.f32 %v767_v14, 0.0 }
 0x1e2   : > { %v772_v18 = vpack.c.bf16 %v771_v17, %v770_v16 }
 0x1e4   : > { %1110 = vmatmul.mubr.bf16.vlgmr.msra.gmra.mrb[4].mxu1 %v772_v18 }
 0x2b7   : > { %v878_v20 = vpop.f32.mrb[4].mxu1 }
 0x2b8   : > { %v879_v21 = vadd.f32 %v999_v19, %v878_v20  ;;  %v1111_v22 = vpop.f32.mrb[5].mxu1 }
 0x2b9   : > { %v881_v23 = vpop.f32.mrb[6].mxu1 }
 0x2ba   : > { %885 = vst [vmem:[%s283_s30] sm:$0xff] %v879_v21  ;;  %v882_v24 = vadd.f32 %v999_v19, %v881_v23  ;;  %v1112_v25 = vpop.f32.mrb[7].mxu1 }
 0x2bc   : > { %886 = vst [vmem:[%s283_s30 + $0x8] sm:$0xff] %v882_v24 }
 0x2bd PF: > { %s17_s24 = sadd.s32 1, %s1183_s24  }
 0x2be   : > { %p14_p4 = scmp.ge.s32.totalorder %s17_s24, 4  }
 0x2c0   :  { %16 = sbr.rel (!%p14_p4) target bundleno = 1 (0x1), region = 78 }

</bundles_post_ra>
